<compile_context>
chip_gen: v6e
topology: v6e:2x2x1
jax: 0.10.0
libtpu: 0.0.40
codegen_flags: <defaults>
</compile_context>

<pallas_src>
import numpy as np
import jax
import jax.numpy as jnp
from jax.experimental import pallas as pl
from jax.experimental.pallas import tpu as pltpu


_NEG_PAD = -1e9            # padding value for logits (never wins the row max)


def tree_loss_kernel(pred_ref, mask_ref, tgt_ref, wv_ref, out_ref):
    pred = pred_ref[...]                                   # [TN, C] f32
    tn, C = pred.shape
    K = mask_ref.shape[0]                                  # true hierarchy depth

    # Shared softmax shift + single EUP exp pass reused by every level.
    m = jnp.max(pred, axis=-1, keepdims=True)              # [TN, 1]
    e = jnp.exp(pred - m)                                  # [TN, C]

    # Hoisted class iota; broadcasting does the rest (never [K, TN, C]).
    cls_iota = jax.lax.broadcasted_iota(jnp.int32, (1, C), 1)

    # Per-sample columns of the per-level weights / target indices:
    # [K8, TN] (lane layout) -> [TN, K8] (sublane layout), once per tile.
    wv_t = jnp.transpose(wv_ref[...])                      # [TN, K8] f32
    tgt_t = jnp.transpose(tgt_ref[...])                    # [TN, K8] i32

    tiny = jnp.float32(1e-30)
    lse_acc = jnp.zeros((tn, 1), jnp.float32)
    coef = jnp.zeros((tn, C), jnp.float32)

    # K is small & static -> unrolled; every big temporary stays [TN, C].
    for k in range(K):
        wv_k = wv_t[:, k:k + 1]                            # [TN, 1]
        sel = jnp.where(mask_ref[k] != 0, e, 0.0)          # int8 mask, no convert
        s_k = jnp.sum(sel, axis=-1, keepdims=True)         # [TN, 1]
        # wv_k == 0 for padded rows / invalid levels -> exact 0 contribution;
        # `tiny` guards log(0) if a level underflows against the global max.
        lse_acc = lse_acc + wv_k * (jnp.log(jnp.maximum(s_k, tiny)) + m)
        coef = coef + jnp.where(cls_iota == tgt_t[:, k:k + 1], wv_k, 0.0)

    # sum_k wv_k * pred[tgt_k] with a single lane reduction.
    tgt_part = jnp.sum(coef * pred, axis=-1, keepdims=True)  # [TN, 1]
    out_ref[...] = lse_acc - tgt_part


def _round_up(x, m):
    return -(-x // m) * m


def _vmem_budget():
    """(tiling budget, physical VMEM capacity) for the current chip."""
    cap = 128 << 20
    try:
        cap = int(pltpu.get_tpu_info().vmem_capacity_bytes)
    except Exception:
        pass                        # conservative default if query unavailable
    return (cap * 5) // 8, cap      # leave headroom for compiler scratch


def _working_set(tn, C_pad, K):
    """Double-buffered block bytes + in-kernel [TN, C] f32 temporaries."""
    K8 = _round_up(K, 8)
    blocks = 2 * (tn * C_pad * 4        # pred f32
                  + K * tn * C_pad      # mask int8
                  + 2 * K8 * tn * 4     # tgt i32 + wv f32
                  + tn * 4)             # per-sample loss
    temps = 6 * tn * C_pad * 4          # pred/e/coef + per-level selects + slack
    return blocks + temps


def _pick_tn(N, C_pad, K, budget_bytes):
    tn = 1024
    while tn > 128 and _working_set(tn, C_pad, K) > budget_bytes:
        tn //= 2
    if N > 128:                         # >= 2 tiles so both v7x TCs get work
        tn = min(tn, max(128, _round_up(-(-N // 2), 128)))
    return max(128, min(tn, _round_up(N, 128)))


def tree_loss_pallas(preds, masks, tgts, wv, *, tn=None):
    """preds [N,C] f32, masks [K,N,C] int8, tgts [K,N] i32, wv [K,N] f32.
    Returns scalar sum_i sum_k wv[k,i]*(masked_lse_ik - pred[i, tgts[k,i]])."""
    N, C = preds.shape
    K = masks.shape[0]
    K8 = _round_up(K, 8)
    C_pad = _round_up(C, 128)
    budget, cap = _vmem_budget()
    if tn is None:
        tn = _pick_tn(N, C_pad, K, budget)
    n_tiles = -(-N // tn)
    N_pad = n_tiles * tn

    preds = jnp.pad(jnp.asarray(preds, jnp.float32),
                    ((0, N_pad - N), (0, C_pad - C)),
                    constant_values=_NEG_PAD)
    # TODO(synk): for v5e (HBM-bound) the int8 mask could be bit-packed to
    # uint32 [K, N, C/32] with an in-kernel shift/and unpack (8x less traffic).
    masks = jnp.pad(jnp.asarray(masks, jnp.int8),
                    ((0, 0), (0, N_pad - N), (0, C_pad - C)))
    tgts = jnp.pad(jnp.asarray(tgts, jnp.int32),
                   ((0, K8 - K), (0, N_pad - N)))
    wv = jnp.pad(jnp.asarray(wv, jnp.float32),
                 ((0, K8 - K), (0, N_pad - N)))

    ws = _working_set(tn, C_pad, K)
    vmem_limit = int(min(max(ws + ws // 2, 32 << 20), cap - (cap >> 3)))

    out = pl.pallas_call(
        tree_loss_kernel,
        out_shape=jax.ShapeDtypeStruct((N_pad, 1), jnp.float32),
        grid_spec=pltpu.PrefetchScalarGridSpec(
            num_scalar_prefetch=0,
            grid=(n_tiles,),
            in_specs=[
                pl.BlockSpec((tn, C_pad), lambda i: (i, 0)),        # pred
                pl.BlockSpec((K, tn, C_pad), lambda i: (0, i, 0)),  # mask int8
                pl.BlockSpec((K8, tn), lambda i: (0, i)),           # target idx
                pl.BlockSpec((K8, tn), lambda i: (0, i)),           # folded weights
            ],
            out_specs=pl.BlockSpec((tn, 1), lambda i: (i, 0)),
        ),
        compiler_params=pltpu.CompilerParams(
            dimension_semantics=("parallel",),
            vmem_limit_bytes=vmem_limit),
    )(preds, masks, tgts, wv)
    return jnp.sum(out)


class TreeLoss:
    """Mirror of the PyTorch module's forward (info path, dense encoding).

    info = (level_mask [C,K,C] 0/1, level_tgt_idx [C,K] global class index of
            each level's target, level_valid [C,K] 0/1, num_levels [C]).
    """

    def __init__(self, reduction='mean', loss_weight=1.0, info=None):
        self.reduction = reduction
        self.loss_weight = loss_weight
        self.info = info

    def forward(self, cls_score, label, hierarchy=None, vocab=None,
                weight=None, avg_factor=None, reduction_override=None, **kwargs):
        assert reduction_override in (None, 'none', 'mean', 'sum')
        # NOTE: like the reference PyTorch code, the resolved `reduction` is
        # never applied -- tree_cross_entropy always averages over samples.
        level_mask, level_tgt_idx, level_valid, num_levels = self.info
        cls_score = jnp.asarray(cls_score, jnp.float32)
        N, C = cls_score.shape
        lab = np.asarray(label)

        w = (np.ones((C,), np.float32) if weight is None
             else np.asarray(weight, np.float32))
        wk = (self.loss_weight * w[lab] /
              (np.asarray(num_levels, np.float32)[lab] * N)).astype(np.float32)

        # Host densification: gather per-sample rows, K leading, int8 mask.
        # TODO(synk): keep the per-class tables resident on device and gather
        # per-sample rows in-kernel (labels via scalar prefetch) to remove the
        # O(K*N*C) host gather and the N-scaling mask HBM stream entirely.
        masks = np.ascontiguousarray(
            np.transpose(np.asarray(level_mask)[lab] > 0, (1, 0, 2))).astype(np.int8)
        tgts = np.ascontiguousarray(
            np.transpose(np.asarray(level_tgt_idx)[lab], (1, 0))).astype(np.int32)
        wv = np.ascontiguousarray(
            np.transpose(np.asarray(level_valid, np.float32)[lab], (1, 0))
            * wk[None, :]).astype(np.float32)

        # Every active level must contain its own target; an all-zero mask row
        # with nonzero weight would otherwise contribute garbage silently.
        tgt_in_mask = np.take_along_axis(masks, tgts[:, :, None], axis=2)[:, :, 0]
        assert not np.any((wv > 0) & (tgt_in_mask == 0)), \
            "active hierarchy level whose mask does not contain its target"

        return tree_loss_pallas(cls_score, masks, tgts, wv)


def ref_tree_loss(preds, labels, level_mask, level_tgt_idx, level_valid,
                  num_levels, weight, loss_weight):
    """Pure-numpy reference replicating tree_cross_entropy (info path)."""
    preds = np.asarray(preds)
    labels = np.asarray(labels)
    N = preds.shape[0]
    total = 0.0
    for i in range(N):
        L = int(labels[i])
        li = 0.0
        for k in range(level_mask.shape[1]):
            if level_valid[L, k] > 0:
                idx = np.nonzero(level_mask[L, k])[0]
                logits = preds[i, idx]
                mmax = logits.max()
                lse = np.log(np.exp(logits - mmax).sum()) + mmax
                t = preds[i, int(level_tgt_idx[L, k])]
                li += lse - t
        li = weight[L] * li / float(num_levels[L])
        total += li
    return loss_weight * total / N


if __name__ == "__main__":
    N, C, G, K = 16, 16, 4, 2          # samples, classes, groups, hierarchy depth
    gsz = C // G
    key = jax.random.PRNGKey(0)
    k1, k2 = jax.random.split(key)
    preds = jax.random.normal(k1, (N, C), jnp.float32)
    labels = jax.random.randint(k2, (N,), 0, C)

    # Deterministic synthetic hierarchy "info":
    #   level 0: siblings within the class's group of `gsz` leaves
    #   level 1: one representative leaf per group (choose-the-group level)
    level_mask = np.zeros((C, K, C), np.float32)
    level_tgt_idx = np.zeros((C, K), np.int64)
    level_valid = np.ones((C, K), np.float32)
    num_levels = np.full((C,), K, np.float32)
    reps = [g * gsz for g in range(G)]
    for c in range(C):
        g = c // gsz
        level_mask[c, 0, g * gsz:(g + 1) * gsz] = 1.0
        level_tgt_idx[c, 0] = c
        level_mask[c, 1, reps] = 1.0
        level_tgt_idx[c, 1] = g * gsz

    # Deterministic per-class weights (plays the role of the optional `weight`).
    weight = (0.5 + 0.05 * np.arange(C)).astype(np.float32)
    loss_weight = 1.0

    # TODO(synk): the `info is None` branch (anytree hierarchy walk + vocab.index
    # lookups) is host-side graph traversal with no Pallas equivalent; it is
    # densified into the arrays above instead.

    loss_mod = TreeLoss(reduction='mean', loss_weight=loss_weight,
                        info=(level_mask, level_tgt_idx, level_valid, num_levels))
    loss = loss_mod.forward(preds, labels, weight=weight)
    loss = jax.block_until_ready(loss)

    ref = ref_tree_loss(preds, labels, level_mask, level_tgt_idx, level_valid,
                        num_levels, weight, loss_weight)
    assert abs(float(loss) - float(ref)) < 1e-4 * max(1.0, abs(float(ref))), \
        (float(loss), float(ref))
    print("KERNEL_OK")
</pallas_src>

<mosaic_0001>
module attributes {stable_mosaic.version = 11 : i64} {
  func.func @tree_loss_kernel(%arg0: i32, %arg1: memref<128x128xf32, #tpu.memory_space<vmem>>, %arg2: memref<2x128x128xi8, #tpu.memory_space<vmem>>, %arg3: memref<8x128xi32, #tpu.memory_space<vmem>>, %arg4: memref<8x128xf32, #tpu.memory_space<vmem>>, %arg5: memref<128x1xf32, #tpu.memory_space<vmem>>) attributes {dimension_semantics = [#tpu.dimension_semantics<parallel>], iteration_bounds = array<i64: 1>, scalar_prefetch = 0 : i64, scratch_operands = 0 : i64, tpu.core_type = #tpu.core_type<tc>, window_params = [{transform_indices = @transform_0, window_bounds = array<i64: 128, 128>}, {transform_indices = @transform_1, window_bounds = array<i64: 2, 128, 128>}, {transform_indices = @transform_2, window_bounds = array<i64: 8, 128>}, {transform_indices = @transform_3, window_bounds = array<i64: 8, 128>}, {transform_indices = @transform_4, window_bounds = array<i64: 128, 1>}]} {
    %c0 = arith.constant 0 : index
    %c0_0 = arith.constant 0 : index
    %0 = vector.load %arg1[%c0, %c0_0] : memref<128x128xf32, #tpu.memory_space<vmem>>, vector<128x128xf32>
    %cst = arith.constant dense<0xFF800000> : vector<128xf32>
    %1 = vector.multi_reduction <maximumf>, %0, %cst [1] : vector<128x128xf32> to vector<128xf32>
    %2 = vector.shape_cast %1 : vector<128xf32> to vector<128x1xf32>
    %3 = vector.broadcast %2 : vector<128x1xf32> to vector<128x128xf32>
    %4 = arith.subf %0, %3 : vector<128x128xf32>
    %5 = math.exp %4 : vector<128x128xf32>
    %6 = tpu.iota {dimensions = array<i32: 1>} : vector<1x128xi32>
    %c0_1 = arith.constant 0 : index
    %c0_2 = arith.constant 0 : index
    %7 = vector.load %arg4[%c0_1, %c0_2] : memref<8x128xf32, #tpu.memory_space<vmem>>, vector<8x128xf32>
    %8 = tpu.transpose %7, [1, 0] : vector<8x128xf32> -> vector<128x8xf32>
    %c0_3 = arith.constant 0 : index
    %c0_4 = arith.constant 0 : index
    %9 = vector.load %arg3[%c0_3, %c0_4] : memref<8x128xi32, #tpu.memory_space<vmem>>, vector<8x128xi32>
    %10 = tpu.transpose %9, [1, 0] : vector<8x128xi32> -> vector<128x8xi32>
    %cst_5 = arith.constant 0.000000e+00 : f32
    %11 = vector.broadcast %cst_5 : f32 to vector<128x1xf32>
    %cst_6 = arith.constant 0.000000e+00 : f32
    %12 = vector.broadcast %cst_6 : f32 to vector<128x128xf32>
    %13 = vector.extract_strided_slice %8 {offsets = [0, 0], sizes = [128, 1], strides = [1, 1]} : vector<128x8xf32> to vector<128x1xf32>
    %c0_7 = arith.constant 0 : index
    %c0_8 = arith.constant 0 : index
    %c0_9 = arith.constant 0 : index
    %14 = vector.load %arg2[%c0_7, %c0_8, %c0_9] : memref<2x128x128xi8, #tpu.memory_space<vmem>>, vector<1x128x128xi8>
    %15 = vector.shape_cast %14 : vector<1x128x128xi8> to vector<128x128xi8>
    %c0_i8 = arith.constant 0 : i8
    %16 = vector.broadcast %c0_i8 : i8 to vector<128x128xi8>
    %17 = arith.cmpi ne, %15, %16 : vector<128x128xi8>
    %cst_10 = arith.constant 0.000000e+00 : f32
    %18 = vector.broadcast %cst_10 : f32 to vector<128x128xf32>
    %19 = arith.select %17, %5, %18 : vector<128x128xi1>, vector<128x128xf32>
    %cst_11 = arith.constant dense<0.000000e+00> : vector<128xf32>
    %20 = vector.multi_reduction <add>, %19, %cst_11 [1] : vector<128x128xf32> to vector<128xf32>
    %21 = vector.shape_cast %20 : vector<128xf32> to vector<128x1xf32>
    %cst_12 = arith.constant 1.000000e-30 : f32
    %22 = vector.broadcast %cst_12 : f32 to vector<128x1xf32>
    %23 = arith.maximumf %21, %22 : vector<128x1xf32>
    %24 = math.log %23 : vector<128x1xf32>
    %25 = arith.addf %24, %2 : vector<128x1xf32>
    %26 = arith.mulf %13, %25 : vector<128x1xf32>
    %27 = arith.addf %11, %26 : vector<128x1xf32>
    %28 = vector.extract_strided_slice %10 {offsets = [0, 0], sizes = [128, 1], strides = [1, 1]} : vector<128x8xi32> to vector<128x1xi32>
    %29 = vector.broadcast %6 : vector<1x128xi32> to vector<128x128xi32>
    %30 = vector.broadcast %28 : vector<128x1xi32> to vector<128x128xi32>
    %31 = arith.cmpi eq, %29, %30 : vector<128x128xi32>
    %cst_13 = arith.constant 0.000000e+00 : f32
    %32 = vector.shape_cast %13 : vector<128x1xf32> to vector<128x1xf32>
    %33 = vector.broadcast %32 : vector<128x1xf32> to vector<128x128xf32>
    %34 = vector.broadcast %cst_13 : f32 to vector<128x128xf32>
    %35 = arith.select %31, %33, %34 : vector<128x128xi1>, vector<128x128xf32>
    %36 = arith.addf %12, %35 : vector<128x128xf32>
    %37 = vector.extract_strided_slice %8 {offsets = [0, 1], sizes = [128, 1], strides = [1, 1]} : vector<128x8xf32> to vector<128x1xf32>
    %c1 = arith.constant 1 : index
    %c0_14 = arith.constant 0 : index
    %c0_15 = arith.constant 0 : index
    %38 = vector.load %arg2[%c1, %c0_14, %c0_15] : memref<2x128x128xi8, #tpu.memory_space<vmem>>, vector<1x128x128xi8>
    %39 = vector.shape_cast %38 : vector<1x128x128xi8> to vector<128x128xi8>
    %c0_i8_16 = arith.constant 0 : i8
    %40 = vector.broadcast %c0_i8_16 : i8 to vector<128x128xi8>
    %41 = arith.cmpi ne, %39, %40 : vector<128x128xi8>
    %cst_17 = arith.constant 0.000000e+00 : f32
    %42 = vector.broadcast %cst_17 : f32 to vector<128x128xf32>
    %43 = arith.select %41, %5, %42 : vector<128x128xi1>, vector<128x128xf32>
    %cst_18 = arith.constant dense<0.000000e+00> : vector<128xf32>
    %44 = vector.multi_reduction <add>, %43, %cst_18 [1] : vector<128x128xf32> to vector<128xf32>
    %45 = vector.shape_cast %44 : vector<128xf32> to vector<128x1xf32>
    %cst_19 = arith.constant 1.000000e-30 : f32
    %46 = vector.broadcast %cst_19 : f32 to vector<128x1xf32>
    %47 = arith.maximumf %45, %46 : vector<128x1xf32>
    %48 = math.log %47 : vector<128x1xf32>
    %49 = arith.addf %48, %2 : vector<128x1xf32>
    %50 = arith.mulf %37, %49 : vector<128x1xf32>
    %51 = arith.addf %27, %50 : vector<128x1xf32>
    %52 = vector.extract_strided_slice %10 {offsets = [0, 1], sizes = [128, 1], strides = [1, 1]} : vector<128x8xi32> to vector<128x1xi32>
    %53 = vector.broadcast %6 : vector<1x128xi32> to vector<128x128xi32>
    %54 = vector.broadcast %52 : vector<128x1xi32> to vector<128x128xi32>
    %55 = arith.cmpi eq, %53, %54 : vector<128x128xi32>
    %cst_20 = arith.constant 0.000000e+00 : f32
    %56 = vector.shape_cast %37 : vector<128x1xf32> to vector<128x1xf32>
    %57 = vector.broadcast %56 : vector<128x1xf32> to vector<128x128xf32>
    %58 = vector.broadcast %cst_20 : f32 to vector<128x128xf32>
    %59 = arith.select %55, %57, %58 : vector<128x128xi1>, vector<128x128xf32>
    %60 = arith.addf %36, %59 : vector<128x128xf32>
    %61 = arith.mulf %60, %0 : vector<128x128xf32>
    %cst_21 = arith.constant dense<0.000000e+00> : vector<128xf32>
    %62 = vector.multi_reduction <add>, %61, %cst_21 [1] : vector<128x128xf32> to vector<128xf32>
    %63 = vector.shape_cast %62 : vector<128xf32> to vector<128x1xf32>
    %64 = arith.subf %51, %63 : vector<128x1xf32>
    %c0_22 = arith.constant 0 : index
    %c0_23 = arith.constant 0 : index
    %65 = vector.load %arg5[%c0_22, %c0_23] : memref<128x1xf32, #tpu.memory_space<vmem>>, vector<128x1xf32>
    tpu.vector_store %arg5[%c0_22, %c0_23], %64 {strides = array<i32>} : memref<128x1xf32, #tpu.memory_space<vmem>>, vector<128x1xf32>,
    return
  }
  func.func @transform_0(%arg0: i32) -> (i32, i32) {
    %c0_i32 = arith.constant 0 : i32
    %c0_i32_0 = arith.constant 0 : i32
    return %arg0, %c0_i32 : i32, i32
  }
  func.func @transform_1(%arg0: i32) -> (i32, i32, i32) {
    %c0_i32 = arith.constant 0 : i32
    %c0_i32_0 = arith.constant 0 : i32
    %c0_i32_1 = arith.constant 0 : i32
    return %c0_i32, %arg0, %c0_i32_0 : i32, i32, i32
  }
  func.func @transform_2(%arg0: i32) -> (i32, i32) {
    %c0_i32 = arith.constant 0 : i32
    %c0_i32_0 = arith.constant 0 : i32
    return %c0_i32, %arg0 : i32, i32
  }
  func.func @transform_3(%arg0: i32) -> (i32, i32) {
    %c0_i32 = arith.constant 0 : i32
    %c0_i32_0 = arith.constant 0 : i32
    return %c0_i32, %arg0 : i32, i32
  }
  func.func @transform_4(%arg0: i32) -> (i32, i32) {
    %c0_i32 = arith.constant 0 : i32
    %c0_i32_0 = arith.constant 0 : i32
    return %arg0, %c0_i32 : i32, i32
  }
}

</mosaic_0001>

<bundles_post_ra>
// kernel: tpu_custom_call.1
= control target key start
LH: loop header
LB: loop body
LE: loop exit
PB: predicated region body
PF: predicated region fallthrough
CT: control target
= control target key end

     0   :  { %9 = vsyncpa [#allocation3], 0  ;;  %s2723_s0 = inlined_call_operand.hbm [shape: f32[128,128], index: 0, kind: input, shape index: {}]   ;;  %s2724_s1 = inlined_call_operand.hbm [shape: s8[2,128,128], index: 1, kind: input, shape index: {}]   ;;  %s2725_s2 = inlined_call_operand.hbm [shape: s32[8,128], index: 2, kind: input, shape index: {}]   ;;  %s2726_s3 = inlined_call_operand.hbm [shape: f32[8,128], index: 3, kind: input, shape index: {}]   ;;  %s2727_s4 = inlined_call_operand.vmem [shape: f32[128,1], index: 4, kind: output, shape index: {}]  }
   0x1   :  { %10 = vsyncpa [#allocation5], 0 }
   0x2   :  { %11 = vsyncpa [#allocation8], 0  ;;  %s1471_s15 = smov [#allocation4]   ;;  %s1472_s17 = smov [#allocation2]  }
   0x3   :  { %s29_s16 = sshll.u32 %s1471_s15, 4  ;;  %s17_s18 = sshll.u32 %s1472_s17, 4  ;;  %s30_s16 = int_to_ptr.vmem [resolvable:$true] %s29_s16  ;;  %s18_s18 = int_to_ptr.vmem [resolvable:$true] %s17_s18 }
   0x4   :  { %s1393_s19 = scalar_lea.vmem %s30_s16, 1024  ;;  %p1398_p1 = scmp.lt.s32.totalorder %s30_s16, %s30_s16 }
   0x5   :  { %p1394_p0 = scmp.ne.s32.totalorder %s30_s16, %s1393_s19  ;;  %p1399_p2 = scmp.lt.s32.totalorder %s1393_s19, %s1393_s19 }
   0x7   :  { %p1400_p3 = por %p1399_p2, %p1398_p1 }
   0x9   :  { %p1401_p4 = pnand %p1400_p3, %p1394_p0 }
   0xb   :  { %1404 = shalt.err (!%p1401_p4)
}
   0xc   :  { %s1473_s20 = smov 128   ;;  %s1474_s21 = smov 8  }
   0xd   :  { %35 = dma.hbm_to_vmem [thread:$0]  %s2724_s1, 1024, %s30_s16, [#allocation5], %s1473_s20, %s1473_s20, %s1474_s21  }
   0xe   :  { %s1413_s24 = scalar_lea.vmem %s18_s18, 2048  ;;  %p1418_p6 = scmp.lt.s32.totalorder %s18_s18, %s18_s18 }
   0xf   :  { %p1414_p5 = scmp.ne.s32.totalorder %s18_s18, %s1413_s24  ;;  %p1419_p7 = scmp.lt.s32.totalorder %s1413_s24, %s1413_s24 }
  0x11   :  { %p1420_p8 = por %p1419_p7, %p1418_p6 }
  0x13   :  { %p1421_p9 = pnand %p1420_p8, %p1414_p5 }
  0x15   :  { %1424 = shalt.err (!%p1421_p9)
}
  0x16   :  { %23 = dma.hbm_to_vmem [thread:$0]  %s2723_s0, 2048, %s18_s18, [#allocation3], %s1473_s20, %s1473_s20, %s1474_s21  }
  0x17   :  { %s1475_s27 = smov [#allocation6]   ;;  %s1476_s29 = smov [#allocation7]  }
  0x18   :  { %s42_s28 = sshll.u32 %s1475_s27, 4  ;;  %s52_s30 = sshll.u32 %s1476_s29, 4  ;;  %s43_s28 = int_to_ptr.vmem [resolvable:$true] %s42_s28  ;;  %s53_s30 = int_to_ptr.vmem [resolvable:$true] %s52_s30 }
  0x19   :  { %s1433_s5 = scalar_lea.vmem %s43_s28, 128  ;;  %p1438_p11 = scmp.lt.s32.totalorder %s43_s28, %s43_s28 }
  0x1a   :  { %p1434_p10 = scmp.ne.s32.totalorder %s43_s28, %s1433_s5  ;;  %p1439_p12 = scmp.lt.s32.totalorder %s1433_s5, %s1433_s5 }
  0x1c   :  { %p1440_p13 = por %p1439_p12, %p1438_p11 }
  0x1e   :  { %p1441_p0 = pnand %p1440_p13, %p1434_p10 }
  0x20   :  { %1444 = shalt.err (!%p1441_p0)
}
  0x21   :  { %45 = dma.hbm_to_vmem [thread:$0]  %s2725_s2, 128, %s43_s28, [#allocation5]  }
  0x22   :  { %s1453_s7 = scalar_lea.vmem %s53_s30, 128  ;;  %p1458_p2 = scmp.lt.s32.totalorder %s53_s30, %s53_s30 }
  0x23   :  { %p1454_p1 = scmp.ne.s32.totalorder %s53_s30, %s1453_s7  ;;  %p1459_p3 = scmp.lt.s32.totalorder %s1453_s7, %s1453_s7 }
  0x25   :  { %p1460_p4 = por %p1459_p3, %p1458_p2 }
  0x27   :  { %p1461_p5 = pnand %p1460_p4, %p1454_p1 }
  0x29   :  { %1464 = shalt.err (!%p1461_p5)
}
  0x2a   :  { %55 = dma.hbm_to_vmem [thread:$0]  %s2726_s3, 128, %s53_s30, [#allocation8]  }
  0x2b   :  { %1465 = dma.done.wait [#allocation3], 2048  }
  0x2c   :  { %1466 = vsyncadd [#allocation3], 4294965248 }
  0x2d   :  { %1467 = dma.done.wait [#allocation5], 1152  }
  0x2e   :  { %1468 = vsyncadd [#allocation5], 4294966144 }
  0x2f   :  { %1469 = dma.done.wait [#allocation8], 128  }
  0x30   :  { %1470 = vsyncadd [#allocation8], 4294967168  ;;  %v168_v0 = vld [vmem:[#allocation7] sm:$0xff]  ;;  %v201_v1 = vld [vmem:[#allocation6] sm:$0xff]  ;;  %v2728_v14 = vmov 0   ;;  %s1479_s2 = smov 127  }
  0x31   :  { %169 = vxpose.xlu0.b32.start.end [1/1] (short) %v168_v0, 128  ;;  %202 = vxpose.xlu1.b32.start.end [1/1] (short) %v201_v1, 128  ;;  %v1517_v2 = vld [vmem:[#allocation2 + $0x10] sm:$0xff]  ;;  %v1520_v3 = vld [vmem:[#allocation2 + $0x18] sm:$0xff]  ;;  %v1522_v4 = vld [vmem:[#allocation2] sm:$0xff] }
  0x32   :  { %v1525_v5 = vld [vmem:[#allocation2 + $0x28] sm:$0xff]  ;;  %v1531_v7 = vld [vmem:[#allocation2 + $0x38] sm:$0xff]  ;;  %v1534_v8 = vld [vmem:[#allocation2 + $0x20] sm:$0xff] }
  0x33   :  { %v1528_v6 = vld [vmem:[#allocation2 + $0x8] sm:$0xff]  ;;  %v1540_v10 = vld [vmem:[#allocation2 + $0x30] sm:$0xff]  ;;  %v1543_v11 = vld [vmem:[#allocation2 + $0x58] sm:$0xff] }
  0x34   :  { %v1537_v9 = vld [vmem:[#allocation2 + $0x48] sm:$0xff]  ;;  %v1546_v12 = vld [vmem:[#allocation2 + $0x40] sm:$0xff]  ;;  %v1553_v15 = vld [vmem:[#allocation2 + $0x50] sm:$0xff] }
  0x35   :  { %v1549_v13 = vld [vmem:[#allocation2 + $0x68] sm:$0xff]  ;;  %v1557_v16 = vld [vmem:[#allocation2 + $0x78] sm:$0xff]  ;;  %v1560_v17 = vld [vmem:[#allocation2 + $0x60] sm:$0xff] }
  0x36   :  { %v1564_v18 = vld [vmem:[#allocation2 + $0x70] sm:$0xff]  ;;  %v234_v38 = vld [vmem:[#allocation4] sm:$0xff]  ;;  %v235_v42 = vld [vmem:[#allocation4 + $0x8] sm:$0xff] }
  0x37   :  { %vm238_vm0 = vnez %v234_v38  ;;  %v679_v43 = vld [vmem:[#allocation4 + $0x20] sm:$0xff]  ;;  %vm239_vm1 = vnez %v235_v42  ;;  %v236_v48 = vld [vmem:[#allocation4 + $0x10] sm:$0xff] }
  0x38   :  { %v242_v41 = vsel %vm238_vm0, 16843009, %v2728_v14  ;;  %vm683_vm2 = vnez %v679_v43  ;;  %v243_v50 = vsel %vm239_vm1, 16843009, %v2728_v14  ;;  %vm240_vm3 = vnez %v236_v48 }
  0x39   :  { %v246_v44 = vunpack.c.0.s8 %v242_v41  ;;  %v248_v45 = vunpack.c.2.s8 %v242_v41  ;;  %v247_v52 = vunpack.c.1.s8 %v242_v41  ;;  %v1616_v53 = vsel %vm683_vm2, 16843009, %v2728_v14 }
  0x3a   :  { %v249_v54 = vunpack.c.3.s8 %v242_v41  ;;  %v250_v55 = vunpack.c.0.s8 %v243_v50  ;;  %v692_v59 = vunpack.c.1.s8 %v1616_v53  ;;  %v691_v60 = vunpack.c.0.s8 %v1616_v53 }
  0x3b   :  { %v262_v49 = vpack.c.b16 %v246_v44, %v246_v44  ;;  %v266_v51 = vpack.c.b16 %v248_v45, %v248_v45  ;;  %v264_v62 = vpack.c.b16 %v247_v52, %v247_v52  ;;  %v244_v63 = vsel %vm240_vm3, 16843009, %v2728_v14  ;;  %v237_v44 = vld [vmem:[#allocation4 + $0x18] sm:$0xff] }
  0x3c   :  { %v693_v0 = vunpack.c.2.s8 %v1616_v53  ;;  %v268_v1 = vpack.c.b16 %v249_v54, %v249_v54  ;;  %v251_v38 = vunpack.c.1.s8 %v243_v50  ;;  %v252_v41 = vunpack.c.2.s8 %v243_v50 }
  0x3d   :  { %v263_v58 = vpack.c.b8 %v262_v49, %v262_v49  ;;  %v267_v61 = vpack.c.b8 %v266_v51, %v266_v51  ;;  %v270_v42 = vpack.c.b16 %v250_v55, %v250_v55  ;;  %v253_v43 = vunpack.c.3.s8 %v243_v50 }
  0x3e   :  { %v254_v48 = vunpack.c.0.s8 %v244_v63  ;;  %v1630_v49 = vpack.c.b16 %v691_v60, %v691_v60  ;;  %v265_v52 = vpack.c.b8 %v264_v62, %v264_v62  ;;  %v269_v50 = vpack.c.b8 %v268_v1, %v268_v1 }
  0x3f   :  { %vm1626_vm4 = vnez %v263_v58  ;;  %vm1632_vm5 = vnez %v267_v61  ;;  %v272_v55 = vpack.c.b16 %v251_v38, %v251_v38  ;;  %v274_v58 = vpack.c.b16 %v252_v41, %v252_v41 }
  0x40   :  { %vm241_vm6 = vnez %v237_v44  ;;  %v256_v60 = vunpack.c.2.s8 %v244_v63  ;;  %v278_v62 = vpack.c.b16 %v254_v48, %v254_v48  ;;  %vm1647_vm7 = vnez %v265_v52 }
  0x41   :  { %vm1659_vm8 = vnez %v269_v50  ;;  %v275_v44 = vpack.c.b8 %v274_v58, %v274_v58 }
  0x42   :  { %v282_v52 = vpack.c.b16 %v256_v60, %v256_v60 }
  0x43   :  { %vm300_vm13 = vnez %v275_v44 }
  0x4f   :  { %1270 = vset.pattern.permute.xlu1 %v2728_v14 }
  0x5a   :  { %1269 = vset.pattern.permute.xlu0 %v2728_v14  ;;  %v709_v14 = vpack.c.b16 %v692_v59, %v692_v59  ;;  %v257_v59 = vunpack.c.3.s8 %v244_v63 }
  0x5c   :  { %v710_v38 = vpack.c.b8 %v709_v14, %v709_v14  ;;  %v284_v50 = vpack.c.b16 %v257_v59, %v257_v59 }
  0x5e   :  { %vm1679_vm10 = vnez %v710_v38  ;;  %v285_v38 = vpack.c.b8 %v284_v50, %v284_v50 }
  0x60   :  { %vm305_vm3 = vnez %v285_v38 }
  0x94   :  { %90 = vmax.xlane.f32.xlu1 %v1517_v2 }
  0x98   :  { %92 = vmax.xlane.f32.xlu1 %v1520_v3 }
  0x9a   :  { %86 = vmax.xlane.f32.xlu0 %v1522_v4 }
  0x9c   :  { %96 = vmax.xlane.f32.xlu1 %v1525_v5 }
  0x9e   :  { %88 = vmax.xlane.f32.xlu0 %v1528_v6 }
  0xa0   :  { %100 = vmax.xlane.f32.xlu1 %v1531_v7 }
  0xa2   :  { %94 = vmax.xlane.f32.xlu0 %v1534_v8 }
  0xa4   :  { %104 = vmax.xlane.f32.xlu1 %v1537_v9 }
  0xa6   :  { %98 = vmax.xlane.f32.xlu0 %v1540_v10 }
  0xa8   :  { %108 = vmax.xlane.f32.xlu1 %v1543_v11 }
  0xaa   :  { %102 = vmax.xlane.f32.xlu0 %v1546_v12 }
  0xac   :  { %112 = vmax.xlane.f32.xlu1 %v1549_v13 }
  0xad   :  { %v1567_v19 = vpop.trf.xlu1  ;;  %v1569_v20 = vpop.trf.xlu0 }
  0xae   :  { %106 = vmax.xlane.f32.xlu0 %v1553_v15  ;;  %2794 = vst [vmem:[#allocation12_spill] sm:$0xff] %v1569_v20  ;;  %v2819_v20 = vmov 0  }
  0xaf   :  { %v1643_v61 = vsel %vm1626_vm4, 16843009, %v2819_v20  ;;  %v1652_v1 = vsel %vm241_vm6, 16843009, %v2819_v20  ;;  %v1690_v58 = vsel %vm1659_vm8, 16843009, %v2819_v20 }
  0xb0   :  { %116 = vmax.xlane.f32.xlu1 %v1557_v16  ;;  %v1703_v45 = vsel %vm300_vm13, 16843009, %v2819_v20  ;;  %v1750_v59 = vsel %vm305_vm3, 16843009, %v2819_v20 }
  0xb1   :  { %v1571_v21 = vpop.trf.xlu1  ;;  %v1573_v22 = vpop.trf.xlu0 }
  0xb2   :  { %110 = vmax.xlane.f32.xlu0 %v1560_v17  ;;  %2795 = vst [vmem:[#allocation13_spill] sm:$0xff] %v1571_v21  ;;  %2796 = vst [vmem:[#allocation14_spill] sm:$0xff] %v1573_v22 }
  0xb5   :  { %v1575_v23 = vpop.trf.xlu1  ;;  %v1577_v24 = vpop.trf.xlu0 }
  0xb6   :  { %114 = vmax.xlane.f32.xlu0 %v1564_v18  ;;  %2797 = vst [vmem:[#allocation15_spill] sm:$0xff] %v1577_v24  ;;  %v255_v24 = vunpack.c.1.s8 %v244_v63  ;;  %v273_v63 = vpack.c.b8 %v272_v55, %v272_v55 }
  0xb8   :  { %vm299_vm12 = vnez %v273_v63  ;;  %v1708_v63 = vsel %vm1679_vm10, 16843009, %v2819_v20 }
  0xb9   :  { %v1579_v25 = vpop.trf.xlu1  ;;  %v1581_v26 = vpop.trf.xlu0  ;;  %v1700_v55 = vsel %vm299_vm12, 16843009, %v2819_v20 }
  0xba   :  { %2798 = vst [vmem:[#allocation16_spill] sm:$0xff] %v1581_v26 }
  0xbd   :  { %v1583_v27 = vpop.trf.xlu1  ;;  %v1585_v28 = vpop.trf.xlu0 }
  0xbe   :  { %2799 = vst [vmem:[#allocation17_spill] sm:$0xff] %v1583_v27  ;;  %2800 = vst [vmem:[#allocation18_spill] sm:$0xff] %v1585_v28  ;;  %v276_v28 = vpack.c.b16 %v253_v43, %v253_v43 }
  0xc0   :  { %v277_v48 = vpack.c.b8 %v276_v28, %v276_v28 }
  0xc1   :  { %v1587_v29 = vpop.trf.xlu1  ;;  %v1589_v30 = vpop.trf.xlu0 }
  0xc2   :  { %2801 = vst [vmem:[#allocation19_spill] sm:$0xff] %v1589_v30  ;;  %vm301_vm14 = vnez %v277_v48  ;;  %v682_v30 = vld [vmem:[#allocation4 + $0x38] sm:$0xff] }
  0xc5   :  { %v1591_v31 = vpop.trf.xlu1  ;;  %v1593_v32 = vpop.trf.xlu0 }
  0xc6   :  { %2802 = vst [vmem:[#allocation20_spill] sm:$0xff] %v1591_v31  ;;  %2803 = vst [vmem:[#allocation21_spill] sm:$0xff] %v1593_v32  ;;  %v271_v32 = vpack.c.b8 %v270_v42, %v270_v42  ;;  %v1657_v42 = vsel %vm1632_vm5, 16843009, %v2819_v20 }
  0xc8   :  { %vm1663_vm9 = vnez %v271_v32  ;;  %v1677_v32 = vsel %vm1647_vm7, 16843009, %v2819_v20  ;;  %vm686_vm7 = vnez %v682_v30 }
  0xc9   :  { %v1595_v33 = vpop.trf.xlu1  ;;  %v1597_v34 = vpop.trf.xlu0  ;;  %v1695_v60 = vsel %vm1663_vm9, 16843009, %v2819_v20 }
  0xca   :  { %2804 = vst [vmem:[#allocation22_spill] sm:$0xff] %v1595_v33  ;;  %2805 = vst [vmem:[#allocation23_spill] sm:$0xff] %v1597_v34 }
  0xcd   :  { %v1599_v35 = vpop.trf.xlu1  ;;  %v1601_v36 = vpop.trf.xlu0 }
  0xce   :  { %2806 = vst [vmem:[#allocation24_spill] sm:$0xff] %v1599_v35  ;;  %2807 = vst [vmem:[#allocation25_spill] sm:$0xff] %v1601_v36 }
  0xd1   :  { %v1603_v37 = vpop.trf.xlu1  ;;  %v1605_v39 = vpop.trf.xlu0 }
  0xd2   :  { %2808 = vst [vmem:[#allocation26_spill] sm:$0xff] %v1605_v39  ;;  %v258_v39 = vunpack.c.0.s8 %v1652_v1 }
  0xd5   :  { %v1607_v40 = vpop.trf.xlu1  ;;  %v1610_v46 = vpop.trf.xlu0 }
  0xd6   :  { %2809 = vst [vmem:[#allocation27_spill] sm:$0xff] %v1607_v40  ;;  %2810 = vst [vmem:[#allocation28_spill] sm:$0xff] %v1610_v46  ;;  %v711_v46 = vpack.c.b16 %v693_v0, %v693_v0  ;;  %v708_v0 = vpack.c.b8 %v1630_v49, %v1630_v49  ;;  %v280_v49 = vpack.c.b16 %v255_v24, %v255_v24 }
  0xd8   :  { %v712_v41 = vpack.c.b8 %v711_v46, %v711_v46  ;;  %vm1732_vm4 = vnez %v708_v0  ;;  %v260_v0 = vunpack.c.2.s8 %v1652_v1 }
  0xd9   :  { %v1612_v47 = vpop.trf.xlu1  ;;  %v1618_v56 = vpop.trf.xlu0 }
  0xda   :  { %2811 = vst [vmem:[#allocation29_spill] sm:$0xff] %v1618_v56  ;;  %v279_v56 = vpack.c.b8 %v278_v62, %v278_v62  ;;  %vm1683_vm11 = vnez %v712_v41  ;;  %v283_v62 = vpack.c.b8 %v282_v52, %v282_v52  ;;  %v286_v41 = vpack.c.b16 %v258_v39, %v258_v39 }
  0xdb   :  { %v1716_v39 = vsel %vm301_vm14, 16843009, %v2819_v20  ;;  %v1721_v48 = vsel %vm1683_vm11, 16843009, %v2819_v20 }
  0xdc   :  { %vm302_vm0 = vnez %v279_v56  ;;  %vm304_vm2 = vnez %v283_v62  ;;  %v287_v24 = vpack.c.b8 %v286_v41, %v286_v41  ;;  %v259_v56 = vunpack.c.1.s8 %v1652_v1 }
  0xdd   :  { %v1620_v57 = vpop.trf.xlu1  ;;  %v1636_v54 = vpop.trf.xlu0  ;;  %v1727_v52 = vsel %vm302_vm0, 16843009, %v2819_v20  ;;  %v1745_v41 = vsel %vm304_vm2, 16843009, %v2819_v20  ;;  %v773_v51 = vunpack.c.0.s8 %v1721_v48 }
  0xde   :  { %2812 = vst [vmem:[#allocation30_spill] sm:$0xff] %v1620_v57  ;;  %2817 = vst [vmem:[#allocation31_spill] sm:$0xff] %v1636_v54  ;;  %v680_v57 = vld [vmem:[#allocation4 + $0x28] sm:$0xff]  ;;  %v281_v54 = vpack.c.b8 %v280_v49, %v280_v49  ;;  %vm306_vm5 = vnez %v287_v24  ;;  %v1757_v34 = vpack.c.b16 %v259_v56, %v259_v56  ;;  %v261_v24 = vunpack.c.3.s8 %v1652_v1 }
  0xdf   :  { %vm684_vm15 = vnez %v680_v57  ;;  %vm1801_vm10 = vcmp.ne.s32.totalorder %v773_v51, 0 }
  0xe0   :  { %v1724_v49 = vsel %vm684_vm15, 16843009, %v2819_v20  ;;  %vm303_vm1 = vnez %v281_v54  ;;  %v694_v54 = vunpack.c.3.s8 %v1616_v53 }
  0xe1   :  { %v1638_v36 = vpop.trf.xlu1  ;;  %v1667_v14 = vpop.trf.xlu0  ;;  %v695_v50 = vunpack.c.0.s8 %v1724_v49  ;;  %v697_v43 = vunpack.c.2.s8 %v1724_v49  ;;  %v1742_v38 = vsel %vm303_vm1, 16843009, %v2819_v20  ;;  %v696_v35 = vunpack.c.1.s8 %v1724_v49 }
  0xe2   :  { %2818 = vst [vmem:[#allocation32_spill] sm:$0xff] %v1638_v36  ;;  %2826 = vst [vmem:[#allocation33_spill] sm:$0xff] %v1667_v14  ;;  %v698_v33 = vunpack.c.3.s8 %v1724_v49 }
  0xe3   :  { %v719_v40 = vpack.c.b16 %v697_v43, %v697_v43  ;;  %v1769_v43 = vsel %vm306_vm5, 16843009, %v2819_v20 }
  0xe4   :  { %v721_v30 = vpack.c.b16 %v698_v33, %v698_v33 }
  0xe5   :  { %v1669_v46 = vpop.trf.xlu1  ;;  %v1710_v44 = vpop.trf.xlu0  ;;  %v720_v48 = vpack.c.b8 %v719_v40, %v719_v40  ;;  %v1786_v40 = vsel %vm686_vm7, 16843009, %v2819_v20 }
  0xe6   :  { %2827 = vst [vmem:[#allocation34_spill] sm:$0xff] %v1669_v46  ;;  %2832 = vst [vmem:[#allocation35_spill] sm:$0xff] %v1710_v44  ;;  %v715_v44 = vpack.c.b16 %v695_v50, %v695_v50  ;;  %v681_v46 = vld [vmem:[#allocation4 + $0x30] sm:$0xff]  ;;  %v713_v50 = vpack.c.b16 %v694_v54, %v694_v54  ;;  %v717_v54 = vpack.c.b16 %v696_v35, %v696_v35 }
  0xe7   :  { %vm685_vm6 = vnez %v681_v46  ;;  %vm1795_vm9 = vnez %v720_v48 }
  0xe8   :  { %v716_v22 = vpack.c.b8 %v715_v44, %v715_v44  ;;  %v714_v46 = vpack.c.b8 %v713_v50, %v713_v50  ;;  %v1783_v44 = vpack.c.b16 %v261_v24, %v261_v24  ;;  %v718_v24 = vpack.c.b8 %v717_v54, %v717_v54 }
  0xe9   :  { %v1712_v57 = vpop.trf.xlu1  ;;  %v1753_v53 = vpop.trf.xlu0 }
  0xea   :  { %2833 = vst [vmem:[#allocation36_spill] sm:$0xff] %v1712_v57  ;;  %2836 = vst [vmem:[#allocation37_spill] sm:$0xff] %v1753_v53  ;;  %v1765_v53 = vpack.c.b16 %v260_v0, %v260_v0  ;;  %vm743_vm8 = vnez %v716_v22  ;;  %vm742_vm11 = vnez %v714_v46  ;;  %vm1820_vm12 = vnez %v718_v24 }
  0xeb   :  { %v1808_v48 = vsel %vm743_vm8, 16843009, %v2819_v20  ;;  %v758_v46 = vsel %vm742_vm11, 16843009, %v2819_v20 }
  0xec   :  { %v775_v24 = vunpack.c.0.s8 %v1808_v48  ;;  %v2856_v48 = vunpack.c.0.s8 %v1657_v42 }
  0xee   :  { %vm1849_vm15 = vcmp.ne.s32.totalorder %v2856_v48, 0  ;;  %v2861_v48 = vunpack.c.0.s8 %v1677_v32  ;;  %vm1917_vm8 = vcmp.ne.s32.totalorder %v775_v24, 0 }
  0xf0   :  { %vm1866_vm1 = vcmp.ne.s32.totalorder %v2861_v48, 0 }
 0x11d   :  { %v1755_v62 = vpop.xlane.xlu1 %90 }
 0x11e   :  { %2837 = vst [vmem:[#allocation38_spill] sm:$0xff] %v1755_v62  ;;  %v120_v14 = vsub.f32 %v1517_v2, %v1755_v62 }
 0x120   :  { %v138_v56 = vmul.f32 1.442695, %v120_v14  ;;  %v689_v14 = vsel %vm685_vm6, 16843009, %v2819_v20 }
 0x121   :  { %v1771_v31 = vpop.xlane.xlu1 %92  ;;  %v699_v26 = vunpack.c.0.s8 %v689_v14  ;;  %v700_v2 = vunpack.c.1.s8 %v689_v14 }
 0x122   :  { %2838 = vst [vmem:[#allocation39_spill] sm:$0xff] %v1771_v31  ;;  %1273 = vpow2.f32 %v138_v56  ;;  %v121_v1 = vsub.f32 %v1520_v3, %v1771_v31  ;;  %v755_v3 = vsel %vm1732_vm4, 16843009, %v2819_v20  ;;  %v2850_v56 = vunpack.c.0.s8 %v1643_v61 }
 0x123   :  { %v1779_v0 = vpop.xlane.xlu0 %86  ;;  %v771_v54 = vunpack.c.0.s8 %v755_v3  ;;  %v702_v3 = vunpack.c.3.s8 %v689_v14  ;;  %v760_v61 = vsel %vm1820_vm12, 16843009, %v2819_v20 }
 0x124   :  { %2839 = vst [vmem:[#allocation40_spill] sm:$0xff] %v1779_v0  ;;  %v118_v35 = vsub.f32 %v1522_v4, %v1779_v0  ;;  %v140_v49 = vmul.f32 1.442695, %v121_v1  ;;  %v723_v1 = vpack.c.b16 %v699_v26, %v699_v26  ;;  %v701_v0 = vunpack.c.2.s8 %v689_v14 }
 0x125   :  { %v1793_v50 = vpop.xlane.xlu1 %96  ;;  %v722_v26 = vpack.c.b8 %v721_v30, %v721_v30  ;;  %vm1830_vm13 = vcmp.ne.s32.totalorder %v2850_v56, 0  ;;  %vm1838_vm14 = vcmp.ne.s32.totalorder %v771_v54, 0  ;;  %v729_v54 = vpack.c.b16 %v702_v3, %v702_v3 }
 0x126   :  { %2840 = vst [vmem:[#allocation41_spill] sm:$0xff] %v1793_v50  ;;  %v134_v31 = vmul.f32 1.442695, %v118_v35  ;;  %1275 = vpow2.f32 %v140_v49  ;;  %v123_v4 = vsub.f32 %v1525_v5, %v1793_v50  ;;  %v1815_v5 = vsel %vm1795_vm9, 16843009, %v2819_v20 }
 0x127   :  { %v1805_v28 = vpop.xlane.xlu0 %88  ;;  %v724_v30 = vpack.c.b8 %v723_v1, %v723_v1  ;;  %v727_v14 = vpack.c.b16 %v701_v0, %v701_v0  ;;  %v774_v0 = vunpack.c.0.s8 %v758_v46  ;;  %vm1853_vm0 = vnez %v722_v26 }
 0x128   :  { %2845 = vst [vmem:[#allocation42_spill] sm:$0xff] %v1805_v28  ;;  %1277 = vpow2.f32 %v134_v31  ;;  %v119_v33 = vsub.f32 %v1528_v6, %v1805_v28  ;;  %v144_v35 = vmul.f32 1.442695, %v123_v4  ;;  %v725_v4 = vpack.c.b16 %v700_v2, %v700_v2 }
 0x129   :  { %v1817_v51 = vpop.xlane.xlu1 %100  ;;  %vm1870_vm2 = vnez %v724_v30  ;;  %v728_v3 = vpack.c.b8 %v727_v14, %v727_v14  ;;  %v762_v30 = vsel %vm1853_vm0, 16843009, %v2819_v20  ;;  %v2870_v14 = vunpack.c.0.s8 %v1690_v58 }
 0x12a   :  { %2846 = vst [vmem:[#allocation43_spill] sm:$0xff] %v1817_v51  ;;  %v136_v31 = vmul.f32 1.442695, %v119_v33  ;;  %1279 = vpow2.f32 %v144_v35  ;;  %v125_v6 = vsub.f32 %v1531_v7, %v1817_v51  ;;  %v726_v56 = vpack.c.b8 %v725_v4, %v725_v4 }
 0x12b   :  { %v1826_v50 = vpop.xlane.xlu0 %94  ;;  %vm1890_vm4 = vcmp.ne.s32.totalorder %v2870_v14, 0  ;;  %vm1897_vm5 = vcmp.ne.s32.totalorder %v774_v0, 0  ;;  %v2878_v0 = vunpack.c.0.s8 %v1695_v60  ;;  %vm1931_vm9 = vnez %v728_v3 }
 0x12c   :  { %2849 = vst [vmem:[#allocation44_spill] sm:$0xff] %v1826_v50  ;;  %1281 = vpow2.f32 %v136_v31  ;;  %v122_v33 = vsub.f32 %v1534_v8, %v1826_v50  ;;  %v148_v7 = vmul.f32 1.442695, %v125_v6  ;;  %v704_v31 = vunpack.c.1.s8 %v1786_v40 }
 0x12d   :  { %v1845_v35 = vpop.xlane.xlu1 %104  ;;  %vm1903_vm6 = vnez %v726_v56  ;;  %vm1913_vm7 = vcmp.ne.s32.totalorder %v2878_v0, 0  ;;  %v778_v56 = vunpack.c.0.s8 %v762_v30  ;;  %v2885_v0 = vmov 0 }
 0x12e   :  { %2855 = vst [vmem:[#allocation45_spill] sm:$0xff] %v1845_v35  ;;  %v142_v6 = vmul.f32 1.442695, %v122_v33  ;;  %1283 = vpow2.f32 %v148_v7  ;;  %v127_v49 = vsub.f32 %v1537_v9, %v1845_v35  ;;  %v703_v33 = vunpack.c.0.s8 %v1786_v40 }
 0x12f   :  { %v1860_v28 = vpop.eup %1273  ;;  %v1862_v42 = vpop.xlane.xlu0 %98  ;;  %v776_v7 = vunpack.c.0.s8 %v760_v61  ;;  %v2866_v35 = vunpack.c.0.s8 %v1708_v63  ;;  %v2888_v30 = vunpack.c.0.s8 %v1700_v55  ;;  %v764_v3 = vsel %vm1903_vm6, 16843009, %v2819_v20 }
 0x130   :  { %1285 = vpow2.f32 %v142_v6  ;;  %v124_v9 = vsub.f32 %v1540_v10, %v1862_v42  ;;  %v152_v4 = vmul.f32 1.442695, %v127_v49  ;;  %v733_v6 = vpack.c.b16 %v704_v31, %v704_v31 }
 0x131   :  { %vm1879_vm3 = vcmp.ne.s32.totalorder %v2866_v35, 0  ;;  %v1886_v48 = vpop.xlane.xlu1 %108  ;;  %v730_v35 = vpack.c.b8 %v729_v54, %v729_v54  ;;  %v1926_v31 = vpack.c.b16 %v703_v33, %v703_v33  ;;  %vm1935_vm11 = vcmp.ne.s32.totalorder %v776_v7, 0 }
 0x132   :  { %2869 = vst [vmem:[#allocation46_spill] sm:$0xff] %v1886_v48  ;;  %v146_v8 = vmul.f32 1.442695, %v124_v9  ;;  %1287 = vpow2.f32 %v152_v4  ;;  %v129_v49 = vsub.f32 %v1543_v11, %v1886_v48  ;;  %v1924_v11 = vsel %vm1870_vm2, 16843009, %v2819_v20 }
 0x133   :  { %v1907_v14 = vpop.eup %1275  ;;  %v1909_v51 = vpop.xlane.xlu0 %102  ;;  %v706_v9 = vunpack.c.3.s8 %v1786_v40  ;;  %v2886_v0 = vsel %vm1935_vm11, 4294967295, %v2885_v0  ;;  %vm1945_vm12 = vcmp.ne.s32.totalorder %v2888_v30, 0  ;;  %vm1955_vm0 = vnez %v730_v35 }
 0x134   :  { %2877 = vst [vmem:[#allocation47_spill] sm:$0xff] %v1909_v51  ;;  %1289 = vpow2.f32 %v146_v8  ;;  %v126_v60 = vsub.f32 %v1546_v12, %v1909_v51  ;;  %v156_v4 = vmul.f32 1.442695, %v129_v49  ;;  %v734_v49 = vpack.c.b8 %v733_v6, %v733_v6 }
 0x135   :  { %v1939_v26 = vpop.eup %1277  ;;  %v1941_v33 = vpop.xlane.xlu1 %112  ;;  %v2894_v35 = vunpack.c.0.s8 %v1703_v45  ;;  %v705_v6 = vunpack.c.2.s8 %v1786_v40  ;;  %v360_v45 = vsel %vm1849_vm15, %v1860_v28, 0.0  ;;  %v2900_v40 = vunpack.c.0.s8 %v1716_v39 }
 0x136   :  { %2887 = vst [vmem:[#allocation48_spill] sm:$0xff] %v1941_v33  ;;  %v150_v48 = vmul.f32 1.442695, %v126_v60  ;;  %v358_v55 = vsel %vm1830_vm13, %v1939_v26, 0.0  ;;  %1291 = vpow2.f32 %v156_v4  ;;  %v131_v30 = vsub.f32 %v1549_v13, %v1941_v33 }
 0x137   :  { %v1964_v51 = vpop.eup %1279  ;;  %374 = vadd.xlane.f32.xlu0 %v358_v55  ;;  %v1966_v12 = vpop.xlane.xlu0 %106  ;;  %vm1970_vm2 = vcmp.ne.s32.totalorder %v2894_v35, 0  ;;  %vm1978_vm13 = vcmp.ne.s32.totalorder %v778_v56, 0  ;;  %v737_v13 = vpack.c.b16 %v706_v9, %v706_v9  ;;  %vm1993_vm6 = vcmp.ne.s32.totalorder %v2900_v40, 0 }
 0x138   :  { %2893 = vst [vmem:[#allocation49_spill] sm:$0xff] %v1966_v12  ;;  %1293 = vpow2.f32 %v150_v48  ;;  %v128_v4 = vsub.f32 %v1553_v15, %v1966_v12  ;;  %v160_v55 = vmul.f32 1.442695, %v131_v30  ;;  %v780_v15 = vunpack.c.0.s8 %v764_v3 }
 0x139   :  { %v1987_v35 = vpop.eup %1281  ;;  %v1989_v33 = vpop.xlane.xlu1 %116  ;;  %v766_v1 = vsel %vm1955_vm0, 16843009, %v2819_v20  ;;  %vm2003_vm15 = vnez %v734_v49  ;;  %v2906_v7 = vunpack.c.0.s8 %v1727_v52  ;;  %v361_v52 = vsel %vm1890_vm4, %v1907_v14, 0.0 }
 0x13a   :  { %2899 = vst [vmem:[#allocation50_spill] sm:$0xff] %v1989_v33  ;;  %v154_v30 = vmul.f32 1.442695, %v128_v4  ;;  %v359_v39 = vsel %vm1866_vm1, %v1987_v35, 0.0  ;;  %1295 = vpow2.f32 %v160_v55  ;;  %v133_v40 = vsub.f32 %v1557_v16, %v1989_v33 }
 0x13b   :  { %v2012_v62 = vpop.eup %1283  ;;  %378 = vadd.xlane.f32.xlu0 %v360_v45  ;;  %376 = vadd.xlane.f32.xlu1 %v359_v39  ;;  %v2014_v3 = vpop.xlane.xlu0 %110  ;;  %vm2018_vm0 = vcmp.ne.s32.totalorder %v2906_v7, 0  ;;  %v732_v4 = vpack.c.b8 %v1926_v31, %v1926_v31  ;;  %v735_v16 = vpack.c.b16 %v705_v6, %v705_v6  ;;  %v738_v55 = vpack.c.b8 %v737_v13, %v737_v13  ;;  %v2959_v31 = vld [vmem:[#allocation33_spill] sm:$0xff] }
 0x13c   :  { %2905 = vst [vmem:[#allocation51_spill] sm:$0xff] %v2014_v3  ;;  %1297 = vpow2.f32 %v154_v30  ;;  %v130_v45 = vsub.f32 %v1560_v17, %v2014_v3  ;;  %v164_v39 = vmul.f32 1.442695, %v133_v40  ;;  %v2909_v48 = vunpack.c.0.s8 %v1742_v38 }
 0x13d   :  { %v2032_v7 = vpop.eup %1285  ;;  %vm2043_vm11 = vcmp.ne.s32.totalorder %v780_v15, 0  ;;  %v2912_v6 = vmov 0  ;;  %v782_v17 = vunpack.c.0.s8 %v766_v1  ;;  %v768_v61 = vsel %vm2003_vm15, 16843009, %v2819_v20 }
 0x13e   :  { %vm2036_vm1 = vcmp.ne.s32.totalorder %v2909_v48, 0  ;;  %v2913_v6 = vsel %vm2043_vm11, 4294967295, %v2912_v6  ;;  %v158_v13 = vmul.f32 1.442695, %v130_v45  ;;  %v362_v38 = vsel %vm1913_vm7, %v2032_v7, 0.0  ;;  %v2963_v48 = vld [vmem:[#allocation21_spill] sm:$0xff] }
 0x13f   :  { %1299 = vpow2.f32 %v164_v39  ;;  %v2056_v30 = vpop.eup %1287  ;;  %380 = vadd.xlane.f32.xlu1 %v361_v52  ;;  %382 = vadd.xlane.f32.xlu0 %v362_v38  ;;  %v2058_v15 = vpop.xlane.xlu0 %114  ;;  %v2915_v1 = vunpack.c.0.s8 %v1815_v5  ;;  %v779_v10 = vunpack.c.0.s8 %v1924_v11  ;;  %v765_v40 = vsel %vm1931_vm9, 16843009, %v2819_v20  ;;  %v2962_v38 = vld [vmem:[#allocation18_spill] sm:$0xff] }
 0x140   :  { %2914 = vst [vmem:[#allocation52_spill] sm:$0xff] %v2058_v15  ;;  %vm754_vm7 = vnez %v738_v55  ;;  %1301 = vpow2.f32 %v158_v13  ;;  %v132_v45 = vsub.f32 %v1564_v18, %v2058_v15  ;;  %v363_v52 = vsel %vm1945_vm12, %v1964_v51, 0.0 }
 0x141   :  { %vm2062_vm4 = vcmp.ne.s32.totalorder %v2915_v1, 0  ;;  %v2078_v39 = vpop.eup %1289  ;;  %vm2080_vm15 = vnez %v732_v4  ;;  %v736_v24 = vpack.c.b8 %v735_v16, %v735_v16  ;;  %vm2084_vm9 = vcmp.ne.s32.totalorder %v782_v17, 0 }
 0x142   :  { %v2920_v55 = vmov 0  ;;  %v784_v18 = vunpack.c.0.s8 %v768_v61  ;;  %v162_v13 = vmul.f32 1.442695, %v132_v45  ;;  %v364_v8 = vsel %vm1970_vm2, %v2078_v39, 0.0 }
 0x143   :  { %v2921_v55 = vsel %vm2084_vm9, 4294967295, %v2920_v55  ;;  %v770_v4 = vsel %vm754_vm7, 16843009, %v2819_v20  ;;  %v2095_v1 = vpop.eup %1291  ;;  %384 = vadd.xlane.f32.xlu1 %v363_v52  ;;  %386 = vadd.xlane.f32.xlu0 %v364_v8  ;;  %v2922_v16 = vpack.c.b8 %v1757_v34, %v1757_v34  ;;  %v293_v17 = vpack.c.b8 %v1783_v44, %v1783_v44 }
 0x144   :  { %vm2102_vm11 = vcmp.ne.s32.totalorder %v779_v10, 0  ;;  %v781_v61 = vunpack.c.0.s8 %v765_v40  ;;  %1303 = vpow2.f32 %v162_v13  ;;  %v365_v45 = vsel %vm1993_vm6, %v2012_v62, 0.0 }
 0x145   :  { %vm307_vm12 = vnez %v2922_v16  ;;  %v767_v52 = vsel %vm2080_vm15, 16843009, %v2819_v20  ;;  %v2115_v8 = vpop.eup %1293  ;;  %v2925_v44 = vpack.c.b8 %v1765_v53, %v1765_v53  ;;  %vm2124_vm7 = vnez %v736_v24 }
 0x146   :  { %vm2128_vm6 = vcmp.ne.s32.totalorder %v784_v18, 0  ;;  %v2930_v40 = vmov 0  ;;  %v786_v11 = vunpack.c.0.s8 %v770_v4  ;;  %v366_v13 = vsel %vm2018_vm0, %v2115_v8, 0.0  ;;  %v2961_v18 = vld [vmem:[#allocation37_spill] sm:$0xff] }
 0x147   :  { %vm2120_vm2 = vnez %v2925_v44  ;;  %v2931_v40 = vsel %vm2128_vm6, 4294967295, %v2930_v40  ;;  %v2932_v16 = vunpack.c.0.s8 %v1745_v41  ;;  %v323_v24 = vsel %vm307_vm12, 16843009, %v2819_v20  ;;  %v2145_v44 = vpop.eup %1295  ;;  %388 = vadd.xlane.f32.xlu1 %v365_v45  ;;  %390 = vadd.xlane.f32.xlu0 %v366_v13 }
 0x148   :  { %v338_v4 = vunpack.c.0.s8 %v1769_v43  ;;  %vm309_vm9 = vnez %v293_v17  ;;  %vm2148_vm0 = vcmp.ne.s32.totalorder %v781_v61, 0  ;;  %v783_v41 = vunpack.c.0.s8 %v767_v52  ;;  %v2960_v43 = vld [vmem:[#allocation15_spill] sm:$0xff] }
 0x149   :  { %vm2137_vm15 = vcmp.ne.s32.totalorder %v2932_v16, 0  ;;  %v367_v16 = vsel %vm2036_vm1, %v2056_v30, 0.0  ;;  %v324_v34 = vsel %vm2120_vm2, 16843009, %v2819_v20  ;;  %v769_v45 = vsel %vm2124_vm7, 16843009, %v2819_v20  ;;  %v2164_v17 = vpop.eup %1297 }
 0x14a   :  { %v2937_v61 = vunpack.c.0.s8 %v1750_v59  ;;  %v339_v46 = vunpack.c.0.s8 %v323_v24  ;;  %vm2172_vm1 = vcmp.ne.s32.totalorder %v786_v11, 0  ;;  %v368_v56 = vsel %vm2137_vm15, %v2164_v17, 0.0  ;;  %v2948_v11 = vld [vmem:[#allocation22_spill] sm:$0xff] }
 0x14b   :  { %v325_v13 = vsel %vm309_vm9, 16843009, %v2819_v20  ;;  %392 = vadd.xlane.f32.xlu1 %v367_v16  ;;  %394 = vadd.xlane.f32.xlu0 %v368_v56  ;;  %vm354_vm2 = vcmp.ne.s32.totalorder %v338_v4, 0  ;;  %v340_v24 = vunpack.c.0.s8 %v324_v34  ;;  %vm2185_vm7 = vcmp.ne.s32.totalorder %v783_v41, 0  ;;  %v2953_v41 = vld [vmem:[#allocation23_spill] sm:$0xff]  ;;  %v2958_v20 = vld [vmem:[#allocation12_spill] sm:$0xff] }
 0x14c   :  { %vm2168_vm12 = vcmp.ne.s32.totalorder %v2937_v61, 0  ;;  %v2183_v59 = vpop.eup %1299  ;;  %v785_v61 = vunpack.c.0.s8 %v769_v45  ;;  %vm355_vm9 = vcmp.ne.s32.totalorder %v339_v46, 0  ;;  %v341_v16 = vunpack.c.0.s8 %v325_v13 }
 0x14d   :  { %v369_v53 = vsel %vm2168_vm12, %v2095_v1, 0.0  ;;  %v2195_v5 = vpop.eup %1301  ;;  %vm356_vm15 = vcmp.ne.s32.totalorder %v340_v24, 0  ;;  %v371_v45 = vsel %vm355_vm9, %v2145_v44, 0.0  ;;  %v2947_v24 = vld [vmem:[#allocation14_spill] sm:$0xff]  ;;  %v2973_v32 = vsel %vm2062_vm4, %v2078_v39, 0.0 }
 0x14e   :  { %v370_v4 = vsel %vm354_vm2, %v2195_v5, 0.0  ;;  %v815_v34 = vsel %vm2185_vm7, %v2195_v5, 0.0  ;;  %vm2201_vm6 = vcmp.ne.s32.totalorder %v785_v61, 0  ;;  %vm357_vm12 = vcmp.ne.s32.totalorder %v341_v16, 0  ;;  %v2946_v5 = vld [vmem:[#allocation20_spill] sm:$0xff]  ;;  %v2951_v16 = vld [vmem:[#allocation19_spill] sm:$0xff] }
 0x14f   :  { %396 = vadd.xlane.f32.xlu1 %v369_v53  ;;  %398 = vadd.xlane.f32.xlu0 %v370_v4  ;;  %v373_v13 = vsel %vm357_vm12, %v2183_v59, 0.0  ;;  %v2949_v61 = vld [vmem:[#allocation16_spill] sm:$0xff]  ;;  %v2952_v4 = vld [vmem:[#allocation27_spill] sm:$0xff]  ;;  %v2979_v54 = vsel %vm2148_vm0, %v2164_v17, 0.0  ;;  %v2983_v58 = vsel %vm1838_vm14, %v1939_v26, 0.0  ;;  %v2986_v49 = vsel %vm1897_vm5, %v1907_v14, 0.0 }
 0x150   :  { %v2950_v53 = vld [vmem:[#allocation24_spill] sm:$0xff]  ;;  %v2993_v63 = vsel %vm1978_vm13, %v2012_v62, 0.0  ;;  %vm2995_vm14 = vnez %v2913_v6  ;;  %vm3000_vm5 = vnez %v2931_v40 }
 0x151   :  { %v1304_v52 = vpop.eup %1303  ;;  %v3001_v6 = vsel %vm3000_vm5, %v2145_v44, 0.0 }
 0x152   :  { %v372_v56 = vsel %vm356_vm15, %v1304_v52, 0.0  ;;  %v817_v46 = vsel %vm2201_vm6, %v1304_v52, 0.0  ;;  %v2955_v52 = vld [vmem:[#allocation26_spill] sm:$0xff] }
 0x153   :  { %400 = vadd.xlane.f32.xlu1 %v371_v45  ;;  %402 = vadd.xlane.f32.xlu0 %v372_v56  ;;  %v2954_v45 = vld [vmem:[#allocation30_spill] sm:$0xff] }
 0x154   :  { %v2956_v56 = vld [vmem:[#allocation34_spill] sm:$0xff] }
 0x157   :  { %404 = vadd.xlane.f32.xlu1 %v373_v13  ;;  %v2957_v13 = vld [vmem:[#allocation29_spill] sm:$0xff] }
 0x168   :  { %506 = vperm.xlu1 %1270, %v1571_v21  }
 0x169   :  { %503 = vperm.xlu0 %1269, %v1567_v19  }
 0x16c   :  { %509 = vperm.xlu1 %1270, %v1575_v23  }
 0x16d   :  { %530 = vperm.xlu0 %1269, %v1603_v37  }
 0x170   :  { %512 = vperm.xlu1 %1270, %v1579_v25  }
 0x171   :  { %536 = vperm.xlu0 %1269, %v1612_v47  }
 0x174   :  { %515 = vperm.xlu1 %1270, %v1583_v27   ;;  %v2970_v27 = vsel %vm1917_vm8, %v2032_v7, 0.0 }
 0x175   :  { %542 = vperm.xlu0 %1269, %v1638_v36  }
 0x178   :  { %518 = vperm.xlu1 %1270, %v1587_v29  }
 0x179   :  { %548 = vperm.xlu0 %1269, %v1712_v57   ;;  %v2969_v57 = vsel %vm1801_vm10, %v1860_v28, 0.0  ;;  %vm2989_vm10 = vnez %v2886_v0 }
 0x17a   :  { %v2990_v2 = vsel %vm2989_vm10, %v1964_v51, 0.0 }
 0x17c   :  { %521 = vperm.xlu1 %1270, %v2946_v5   ;;  %v2968_v5 = vsel %vm1879_vm3, %v1987_v35, 0.0  ;;  %vm2997_vm3 = vnez %v2921_v55  ;;  %v3003_v55 = vsel %vm2172_vm1, %v2183_v59, 0.0 }
 0x17d   :  { %573 = vperm.xlu0 %1269, %v2947_v24  }
 0x180   :  { %524 = vperm.xlu1 %1270, %v2948_v11  }
 0x181   :  { %583 = vperm.xlu0 %1269, %v2949_v61  }
 0x184   :  { %527 = vperm.xlu1 %1270, %v2950_v53   ;;  %v2966_v53 = vld [vmem:[#allocation31_spill] sm:$0xff] }
 0x185   :  { %593 = vperm.xlu0 %1269, %v2951_v16  }
 0x188   :  { %533 = vperm.xlu1 %1270, %v2952_v4   ;;  %v2964_v4 = vld [vmem:[#allocation25_spill] sm:$0xff] }
 0x189   :  { %603 = vperm.xlu0 %1269, %v2953_v41  }
 0x18c   :  { %539 = vperm.xlu1 %1270, %v2954_v45   ;;  %v2965_v45 = vld [vmem:[#allocation28_spill] sm:$0xff] }
 0x18d   :  { %613 = vperm.xlu0 %1269, %v2955_v52  }
 0x190   :  { %545 = vperm.xlu1 %1270, %v2956_v56   ;;  %v2967_v56 = vld [vmem:[#allocation35_spill] sm:$0xff] }
 0x191   :  { %623 = vperm.xlu0 %1269, %v2957_v13  }
 0x194   :  { %568 = vperm.xlu1 %1270, %v2958_v20  }
 0x195   :  { %633 = vperm.xlu0 %1269, %v2959_v31  }
 0x198   :  { %578 = vperm.xlu1 %1270, %v2960_v43  }
 0x199   :  { %643 = vperm.xlu0 %1269, %v2961_v18  }
 0x19c   :  { %588 = vperm.xlu1 %1270, %v2962_v38  }
 0x1a0   :  { %598 = vperm.xlu1 %1270, %v2963_v48  }
 0x1a4   :  { %608 = vperm.xlu1 %1270, %v2964_v4  }
 0x1a8   :  { %618 = vperm.xlu1 %1270, %v2965_v45  }
 0x1ac   :  { %628 = vperm.xlu1 %1270, %v2966_v53  }
 0x1b0   :  { %638 = vperm.xlu1 %1270, %v2967_v56  }
 0x1b8   :  { %821 = vadd.xlane.f32.xlu0 %v2968_v5 }
 0x1bc   :  { %823 = vadd.xlane.f32.xlu0 %v2969_v57  ;;  %v2976_v57 = vsel %vm2102_vm11, %v2115_v8, 0.0 }
 0x1c0   :  { %827 = vadd.xlane.f32.xlu0 %v2970_v27  ;;  %v2253_v36 = vpop.xlane.xlu0 %374 }
 0x1c1   :  { %2971 = vst [vmem:[#allocation14_spill] sm:$0xff] %v2253_v36 }
 0x1c4   :  { %v2255_v21 = vpop.xlane.xlu1 %376  ;;  %831 = vadd.xlane.f32.xlu0 %v2973_v32  ;;  %v2261_v35 = vpop.xlane.xlu0 %378 }
 0x1c5   :  { %2972 = vst [vmem:[#allocation22_spill] sm:$0xff] %v2255_v21  ;;  %2974 = vst [vmem:[#allocation16_spill] sm:$0xff] %v2261_v35 }
 0x1c8   :  { %v2263_v22 = vpop.xlane.xlu1 %380  ;;  %835 = vadd.xlane.f32.xlu0 %v2976_v57  ;;  %v2269_v28 = vpop.xlane.xlu0 %382  ;;  %v2998_v57 = vsel %vm2997_vm3, %v2095_v1, 0.0 }
 0x1c9   :  { %2975 = vst [vmem:[#allocation19_spill] sm:$0xff] %v2263_v22  ;;  %2977 = vst [vmem:[#allocation12_spill] sm:$0xff] %v2269_v28 }
 0x1cc   :  { %v2271_v27 = vpop.xlane.xlu1 %384  ;;  %839 = vadd.xlane.f32.xlu0 %v2979_v54  ;;  %v2277_v7 = vpop.xlane.xlu0 %386 }
 0x1cd   :  { %2978 = vst [vmem:[#allocation15_spill] sm:$0xff] %v2271_v27  ;;  %2980 = vst [vmem:[#allocation18_spill] sm:$0xff] %v2277_v7 }
 0x1d0   :  { %v2279_v9 = vpop.xlane.xlu1 %388  ;;  %843 = vadd.xlane.f32.xlu0 %v815_v34  ;;  %v2281_v39 = vpop.xlane.xlu0 %390 }
 0x1d1   :  { %2981 = vst [vmem:[#allocation21_spill] sm:$0xff] %v2279_v9  ;;  %2982 = vst [vmem:[#allocation53_spill] sm:$0xff] %v2281_v39 }
 0x1d4   :  { %819 = vadd.xlane.f32.xlu1 %v2983_v58  ;;  %v2287_v8 = vpop.xlane.xlu1 %392  ;;  %847 = vadd.xlane.f32.xlu0 %v817_v46  ;;  %v2289_v5 = vpop.xlane.xlu0 %394  ;;  %v2996_v46 = vsel %vm2995_vm14, %v2056_v30, 0.0 }
 0x1d5   :  { %2984 = vst [vmem:[#allocation54_spill] sm:$0xff] %v2287_v8  ;;  %2985 = vst [vmem:[#allocation55_spill] sm:$0xff] %v2289_v5 }
 0x1d8   :  { %825 = vadd.xlane.f32.xlu1 %v2986_v49  ;;  %v2295_v17 = vpop.xlane.xlu1 %396  ;;  %v2297_v34 = vpop.xlane.xlu0 %398 }
 0x1d9   :  { %2987 = vst [vmem:[#allocation56_spill] sm:$0xff] %v2295_v17  ;;  %2988 = vst [vmem:[#allocation57_spill] sm:$0xff] %v2297_v34 }
 0x1dc   :  { %829 = vadd.xlane.f32.xlu1 %v2990_v2  ;;  %v2303_v26 = vpop.xlane.xlu1 %400  ;;  %v2305_v32 = vpop.xlane.xlu0 %402 }
 0x1dd   :  { %2991 = vst [vmem:[#allocation58_spill] sm:$0xff] %v2303_v26  ;;  %2992 = vst [vmem:[#allocation59_spill] sm:$0xff] %v2305_v32 }
 0x1e0   :  { %833 = vadd.xlane.f32.xlu1 %v2993_v63  ;;  %v2311_v14 = vpop.xlane.xlu1 %404  ;;  %v1478_v63 = vmov 1  }
 0x1e1   :  { %2994 = vst [vmem:[#allocation60_spill] sm:$0xff] %v2311_v14  ;;  %1271 = vset.pattern.permute.xlu1 %v1478_v63  ;;  %1272 = vset.pattern.permute.xlu0 %v1478_v63  ;;  %v166_v63 = vlaneseq }
 0x1e3   :  { %v2373_v8 = vand.u32 127, %v166_v63 }
 0x1e4   :  { %837 = vadd.xlane.f32.xlu1 %v2996_v46  ;;  %v2317_v0 = vpop.permute.xlu1 %506  ;;  %v2319_v51 = vpop.permute.xlu0 %503 }
 0x1e5   :  { %vm551_vm13 = vcmp.eq.s32.totalorder %v2373_v8, %v2317_v0  ;;  %vm550_vm6 = vcmp.eq.s32.totalorder %v2373_v8, %v2319_v51 }
 0x1e8   :  { %841 = vadd.xlane.f32.xlu1 %v2998_v57  ;;  %v2325_v60 = vpop.permute.xlu1 %509  ;;  %v2327_v62 = vpop.permute.xlu0 %530 }
 0x1e9   :  { %2999 = vst [vmem:[#allocation61_spill] sm:$0xff] %v2327_v62  ;;  %vm552_vm1 = vcmp.eq.s32.totalorder %v2373_v8, %v2325_v60 }
 0x1ec   :  { %845 = vadd.xlane.f32.xlu1 %v3001_v6  ;;  %v2333_v30 = vpop.permute.xlu1 %512  ;;  %v2335_v54 = vpop.permute.xlu0 %536 }
 0x1ed   :  { %3002 = vst [vmem:[#allocation62_spill] sm:$0xff] %v2335_v54  ;;  %vm553_vm9 = vcmp.eq.s32.totalorder %v2373_v8, %v2333_v30 }
 0x1f0   :  { %849 = vadd.xlane.f32.xlu1 %v3003_v55  ;;  %v2341_v1 = vpop.permute.xlu1 %515  ;;  %v2343_v58 = vpop.permute.xlu0 %542 }
 0x1f1   :  { %3004 = vst [vmem:[#allocation63_spill] sm:$0xff] %v2343_v58  ;;  %vm554_vm15 = vcmp.eq.s32.totalorder %v2373_v8, %v2341_v1 }
 0x1f4   :  { %v2345_v49 = vpop.permute.xlu1 %518  ;;  %v549_v2 = vpop.permute.xlu0 %548 }
 0x1f5   :  { %vm565_vm8 = vcmp.eq.s32.totalorder %v2373_v8, %v549_v2  ;;  %vm555_vm14 = vcmp.eq.s32.totalorder %v2373_v8, %v2345_v49 }
 0x1f8   :  { %v2347_v40 = vpop.permute.xlu1 %521  ;;  %v2349_v44 = vpop.permute.xlu0 %573 }
 0x1f9   :  { %vm556_vm3 = vcmp.eq.s32.totalorder %v2373_v8, %v2347_v40 }
 0x1fc   :  { %v2351_v46 = vpop.permute.xlu1 %524  ;;  %v2353_v10 = vpop.permute.xlu0 %583 }
 0x200   :  { %v2355_v59 = vpop.permute.xlu1 %527  ;;  %v2357_v57 = vpop.permute.xlu0 %593 }
 0x201   :  { %v651_v1 = vsel %vm555_vm14, %v2357_v57, 0.0 }
 0x204   :  { %v2359_v6 = vpop.permute.xlu1 %533  ;;  %v2361_v55 = vpop.permute.xlu0 %603 }
 0x205   :  { %3005 = vst [vmem:[#allocation64_spill] sm:$0xff] %v2359_v6 }
 0x208   :  { %v2363_v14 = vpop.permute.xlu1 %539  ;;  %v2365_v32 = vpop.permute.xlu0 %613 }
 0x209   :  { %3006 = vst [vmem:[#allocation65_spill] sm:$0xff] %v2363_v14  ;;  %3007 = vst [vmem:[#allocation66_spill] sm:$0xff] %v2365_v32 }
 0x20c   :  { %v546_v26 = vpop.permute.xlu1 %545  ;;  %v2367_v34 = vpop.permute.xlu0 %623 }
 0x20d   :  { %3008 = vst [vmem:[#allocation67_spill] sm:$0xff] %v2367_v34  ;;  %vm564_vm11 = vcmp.eq.s32.totalorder %v2373_v8, %v546_v26  ;;  %v3015_v26 = vld [vmem:[#allocation42_spill] sm:$0xff] }
 0x210   :  { %v2369_v17 = vpop.permute.xlu1 %568  ;;  %v2371_v5 = vpop.permute.xlu0 %633 }
 0x211   :  { %3009 = vst [vmem:[#allocation68_spill] sm:$0xff] %v2371_v5  ;;  %v646_v0 = vsel %vm550_vm6, %v2369_v17, 0.0 }
 0x214   :  { %v2376_v39 = vpop.permute.xlu1 %578  ;;  %v644_v9 = vpop.permute.xlu0 %643 }
 0x215   :  { %v2378_v7 = vsel %vm565_vm8, %v644_v9, 0.0  ;;  %v648_v51 = vsel %vm552_vm1, %v2376_v39, 0.0 }
 0x216   :  { %3010 = vst [vmem:[#allocation69_spill] sm:$0xff] %v2378_v7 }
 0x218   :  { %v2380_v27 = vpop.permute.xlu1 %588 }
 0x21c   :  { %v2382_v28 = vpop.permute.xlu1 %598 }
 0x21d   :  { %v652_v49 = vsel %vm556_vm3, %v2382_v28, 0.0  ;;  %v1374_v28 = vld [vmem:[#allocation2 + $0x28] sm:$0xff] }
 0x220   :  { %v2384_v22 = vpop.permute.xlu1 %608 }
 0x221   :  { %3011 = vst [vmem:[#allocation70_spill] sm:$0xff] %v2384_v22 }
 0x224   :  { %v2386_v35 = vpop.permute.xlu1 %618 }
 0x225   :  { %3012 = vst [vmem:[#allocation71_spill] sm:$0xff] %v2386_v35 }
 0x228   :  { %v2388_v36 = vpop.permute.xlu1 %628 }
 0x229   :  { %3013 = vst [vmem:[#allocation72_spill] sm:$0xff] %v2388_v36 }
 0x22c   :  { %v639_v63 = vpop.permute.xlu1 %638 }
 0x22d   :  { %v2391_v21 = vsel %vm564_vm11, %v639_v63, 0.0  ;;  %vm557_vm11 = vcmp.eq.s32.totalorder %v2373_v8, %v2351_v46 }
 0x22e   :  { %3014 = vst [vmem:[#allocation73_spill] sm:$0xff] %v2391_v21 }
 0x241   :  { %v822_v2 = vpop.xlane.xlu0 %821 }
 0x242   :  { %v852_v5 = vmax.f32 %v822_v2, 1e-30 }
 0x244   :  { %1305 = vlog2.f32 %v852_v5 }
 0x245   :  { %v824_v9 = vpop.xlane.xlu0 %823 }
 0x246   :  { %v853_v7 = vmax.f32 %v824_v9, 1e-30 }
 0x248   :  { %1307 = vlog2.f32 %v853_v7  ;;  %v3016_v7 = vld [vmem:[#allocation38_spill] sm:$0xff] }
 0x249   :  { %v828_v58 = vpop.xlane.xlu0 %827 }
 0x24a   :  { %v855_v14 = vmax.f32 %v828_v58, 1e-30 }
 0x24c   :  { %1309 = vlog2.f32 %v855_v14 }
 0x24d   :  { %v832_v34 = vpop.xlane.xlu0 %831 }
 0x24e   :  { %v857_v54 = vmax.f32 %v832_v34, 1e-30 }
 0x250   :  { %1311 = vlog2.f32 %v857_v54 }
 0x251   :  { %v1306_v35 = vpop.eup %1305  ;;  %v836_v6 = vpop.xlane.xlu0 %835 }
 0x252   :  { %v870_v36 = vmul.f32 0.6931472, %v1306_v35  ;;  %v859_v32 = vmax.f32 %v836_v6, 1e-30 }
 0x254   :  { %v900_v62 = vadd.f32 %v870_v36, %v3015_v26  ;;  %1313 = vlog2.f32 %v859_v32 }
 0x255   :  { %v1308_v63 = vpop.eup %1307  ;;  %v840_v21 = vpop.xlane.xlu0 %839 }
 0x256   :  { %v872_v2 = vmul.f32 0.6931472, %v1308_v63  ;;  %v861_v5 = vmax.f32 %v840_v21, 1e-30  ;;  %v916_v9 = vmul.f32 %v900_v62, %v2947_v24 }
 0x258   :  { %v901_v22 = vadd.f32 %v872_v2, %v3016_v7  ;;  %1315 = vlog2.f32 %v861_v5  ;;  %949 = vrot.lane.b32.xlu1 %v916_v9, %s1479_s2 }
 0x259   :  { %v1310_v34 = vpop.eup %1309  ;;  %v844_v14 = vpop.xlane.xlu0 %843 }
 0x25a   :  { %v876_v54 = vmul.f32 0.6931472, %v1310_v34  ;;  %v863_v35 = vmax.f32 %v844_v14, 1e-30  ;;  %v917_v58 = vmul.f32 %v901_v22, %v2960_v43 }
 0x25c   :  { %v903_v36 = vadd.f32 %v876_v54, %v1826_v50  ;;  %1317 = vlog2.f32 %v863_v35  ;;  %951 = vrot.lane.b32.xlu1 %v917_v58, %s1479_s2  ;;  %v3017_v58 = vld [vmem:[#allocation47_spill] sm:$0xff] }
 0x25d   :  { %v1312_v21 = vpop.eup %1311  ;;  %v820_v32 = vpop.xlane.xlu1 %819 }
 0x25e   :  { %v848_v62 = vpop.xlane.xlu0 %847  ;;  %v880_v6 = vmul.f32 0.6931472, %v1312_v21  ;;  %v851_v63 = vmax.f32 %v820_v32, 1e-30  ;;  %v919_v5 = vmul.f32 %v903_v36, %v2962_v38 }
 0x25f   :  { %v865_v2 = vmax.f32 %v848_v62, 1e-30 }
 0x260   :  { %v905_v9 = vadd.f32 %v880_v6, %v1862_v42  ;;  %1319 = vlog2.f32 %v851_v63  ;;  %955 = vrot.lane.b32.xlu1 %v919_v5, %s1479_s2 }
 0x261   :  { %v1314_v34 = vpop.eup %1313  ;;  %1321 = vlog2.f32 %v865_v2  ;;  %v826_v22 = vpop.xlane.xlu1 %825 }
 0x262   :  { %v884_v14 = vmul.f32 0.6931472, %v1314_v34  ;;  %v854_v54 = vmax.f32 %v826_v22, 1e-30  ;;  %v921_v35 = vmul.f32 %v905_v9, %v2963_v48 }
 0x264   :  { %v907_v50 = vadd.f32 %v884_v14, %v3017_v58  ;;  %1323 = vlog2.f32 %v854_v54  ;;  %959 = vrot.lane.b32.xlu1 %v921_v35, %s1479_s2 }
 0x265   :  { %v1316_v21 = vpop.eup %1315  ;;  %v830_v32 = vpop.xlane.xlu1 %829 }
 0x266   :  { %v888_v36 = vmul.f32 0.6931472, %v1316_v21  ;;  %v856_v62 = vmax.f32 %v830_v32, 1e-30  ;;  %v923_v6 = vmul.f32 %v907_v50, %v2964_v4 }
 0x268   :  { %v909_v63 = vadd.f32 %v888_v36, %v1966_v12  ;;  %1325 = vlog2.f32 %v856_v62  ;;  %963 = vrot.lane.b32.xlu1 %v923_v6, %s1479_s2  ;;  %v3018_v6 = vld [vmem:[#allocation40_spill] sm:$0xff] }
 0x269   :  { %v1318_v2 = vpop.eup %1317  ;;  %v834_v5 = vpop.xlane.xlu1 %833 }
 0x26a   :  { %v892_v34 = vmul.f32 0.6931472, %v1318_v2  ;;  %v858_v9 = vmax.f32 %v834_v5, 1e-30  ;;  %v925_v22 = vmul.f32 %v909_v63, %v2965_v45 }
 0x26c   :  { %v911_v14 = vadd.f32 %v892_v34, %v2014_v3  ;;  %1327 = vlog2.f32 %v858_v9  ;;  %967 = vrot.lane.b32.xlu1 %v925_v22, %s1479_s2 }
 0x26d   :  { %v1320_v54 = vpop.eup %1319  ;;  %v838_v35 = vpop.xlane.xlu1 %837 }
 0x26e   :  { %v1322_v21 = vpop.eup %1321  ;;  %v868_v50 = vmul.f32 0.6931472, %v1320_v54  ;;  %v860_v32 = vmax.f32 %v838_v35, 1e-30  ;;  %v927_v36 = vmul.f32 %v911_v14, %v2966_v53  ;;  %v3019_v54 = vld [vmem:[#allocation39_spill] sm:$0xff] }
 0x26f   :  { %v896_v62 = vmul.f32 0.6931472, %v1322_v21 }
 0x270   :  { %v899_v12 = vadd.f32 %v868_v50, %v3018_v6  ;;  %1329 = vlog2.f32 %v860_v32  ;;  %971 = vrot.lane.b32.xlu1 %v927_v36, %s1479_s2 }
 0x271   :  { %v1324_v2 = vpop.eup %1323  ;;  %v913_v63 = vadd.f32 %v896_v62, %v2058_v15  ;;  %v842_v5 = vpop.xlane.xlu1 %841  ;;  %v3020_v62 = vld [vmem:[#allocation41_spill] sm:$0xff] }
 0x272   :  { %v874_v34 = vmul.f32 0.6931472, %v1324_v2  ;;  %v862_v9 = vmax.f32 %v842_v5, 1e-30  ;;  %v915_v22 = vmul.f32 %v899_v12, %v2958_v20 }
 0x273   :  { %v929_v3 = vmul.f32 %v913_v63, %v2967_v56 }
 0x274   :  { %v902_v35 = vadd.f32 %v874_v34, %v3019_v54  ;;  %1331 = vlog2.f32 %v862_v9  ;;  %947 = vrot.lane.b32.xlu0 %v915_v22, %s1479_s2  ;;  %v3021_v22 = vld [vmem:[#allocation43_spill] sm:$0xff] }
 0x275   :  { %v1326_v14 = vpop.eup %1325  ;;  %975 = vrot.lane.b32.xlu1 %v929_v3, %s1479_s2  ;;  %v846_v21 = vpop.xlane.xlu1 %845 }
 0x276   :  { %v878_v50 = vmul.f32 0.6931472, %v1326_v14  ;;  %v864_v32 = vmax.f32 %v846_v21, 1e-30  ;;  %v918_v36 = vmul.f32 %v902_v35, %v2949_v61 }
 0x278   :  { %v904_v2 = vadd.f32 %v878_v50, %v3020_v62  ;;  %1333 = vlog2.f32 %v864_v32  ;;  %953 = vrot.lane.b32.xlu0 %v918_v36, %s1479_s2  ;;  %v3022_v50 = vld [vmem:[#allocation45_spill] sm:$0xff] }
 0x279   :  { %v1328_v12 = vpop.eup %1327  ;;  %1012 = vperm.xlu1 %1271, %v1567_v19   ;;  %v850_v63 = vpop.xlane.xlu1 %849 }
 0x27a   :  { %v882_v5 = vmul.f32 0.6931472, %v1328_v12  ;;  %v866_v34 = vmax.f32 %v850_v63, 1e-30  ;;  %v920_v9 = vmul.f32 %v904_v2, %v2951_v16  ;;  %v3023_v12 = vld [vmem:[#allocation46_spill] sm:$0xff] }
 0x27c   :  { %v906_v3 = vadd.f32 %v882_v5, %v3021_v22  ;;  %1335 = vlog2.f32 %v866_v34  ;;  %957 = vrot.lane.b32.xlu0 %v920_v9, %s1479_s2  ;;  %v3024_v9 = vld [vmem:[#allocation48_spill] sm:$0xff] }
 0x27d   :  { %v1330_v14 = vpop.eup %1329  ;;  %1018 = vperm.xlu1 %1271, %v1575_v23  }
 0x27e   :  { %v886_v35 = vmul.f32 0.6931472, %v1330_v14  ;;  %v922_v21 = vmul.f32 %v906_v3, %v2953_v41 }
 0x280   :  { %v908_v32 = vadd.f32 %v886_v35, %v3022_v50  ;;  %961 = vrot.lane.b32.xlu0 %v922_v21, %s1479_s2 }
 0x281   :  { %v1332_v19 = vpop.eup %1331  ;;  %1021 = vperm.xlu1 %1271, %v1579_v25  }
 0x282   :  { %v890_v36 = vmul.f32 0.6931472, %v1332_v19  ;;  %v924_v2 = vmul.f32 %v908_v32, %v2955_v52  ;;  %v3025_v32 = vld [vmem:[#allocation13_spill] sm:$0xff]  ;;  %v3026_v19 = vld [vmem:[#allocation32_spill] sm:$0xff] }
 0x284   :  { %v910_v63 = vadd.f32 %v890_v36, %v3023_v12  ;;  %965 = vrot.lane.b32.xlu0 %v924_v2, %s1479_s2  ;;  %v3028_v36 = vld [vmem:[#allocation36_spill] sm:$0xff]  ;;  %v1369_v12 = vld [vmem:[#allocation2 + $0x8] sm:$0xff] }
 0x285   :  { %v1334_v5 = vpop.eup %1333  ;;  %1027 = vperm.xlu1 %1271, %v1587_v29   ;;  %v3029_v2 = vld [vmem:[#allocation20_spill] sm:$0xff] }
 0x286   :  { %v894_v23 = vmul.f32 0.6931472, %v1334_v5  ;;  %v926_v34 = vmul.f32 %v910_v63, %v2957_v13  ;;  %v3030_v63 = vld [vmem:[#allocation24_spill] sm:$0xff]  ;;  %v3033_v5 = vld [vmem:[#allocation34_spill] sm:$0xff] }
 0x288   :  { %v912_v3 = vadd.f32 %v894_v23, %v3024_v9  ;;  %969 = vrot.lane.b32.xlu0 %v926_v34, %s1479_s2 }
 0x289   :  { %v1336_v14 = vpop.eup %1335  ;;  %1033 = vperm.xlu1 %1271, %v2948_v11   ;;  %v3027_v11 = vld [vmem:[#allocation17_spill] sm:$0xff] }
 0x28a   :  { %v898_v25 = vmul.f32 0.6931472, %v1336_v14  ;;  %v928_v35 = vmul.f32 %v912_v3, %v2959_v31 }
 0x28c   :  { %v914_v21 = vadd.f32 %v898_v25, %v1989_v33  ;;  %973 = vrot.lane.b32.xlu0 %v928_v35, %s1479_s2 }
 0x28d   :  { %1039 = vperm.xlu1 %1271, %v1603_v37   ;;  %v3031_v37 = vld [vmem:[#allocation27_spill] sm:$0xff] }
 0x28e   :  { %v930_v29 = vmul.f32 %v914_v21, %v2961_v18 }
 0x290   :  { %977 = vrot.lane.b32.xlu0 %v930_v29, %s1479_s2 }
 0x291   :  { %1045 = vperm.xlu1 %1271, %v1612_v47   ;;  %v3032_v47 = vld [vmem:[#allocation30_spill] sm:$0xff] }
 0x294   :  { %1015 = vperm.xlu0 %1272, %v3025_v32  }
 0x295   :  { %1051 = vperm.xlu1 %1271, %v3026_v19  }
 0x298   :  { %1024 = vperm.xlu0 %1272, %v3027_v11  }
 0x299   :  { %1057 = vperm.xlu1 %1271, %v3028_v36  }
 0x29c   :  { %1030 = vperm.xlu0 %1272, %v3029_v2  }
 0x29d   :  { %1080 = vperm.xlu1 %1271, %v2947_v24  }
 0x2a0   :  { %1036 = vperm.xlu0 %1272, %v3030_v63  }
 0x2a1   :  { %1088 = vperm.xlu1 %1271, %v2949_v61  }
 0x2a4   :  { %1042 = vperm.xlu0 %1272, %v3031_v37  }
 0x2a5   :  { %1096 = vperm.xlu1 %1271, %v2951_v16  }
 0x2a8   :  { %1048 = vperm.xlu0 %1272, %v3032_v47  }
 0x2a9   :  { %1104 = vperm.xlu1 %1271, %v2953_v41  }
 0x2ac   :  { %1054 = vperm.xlu0 %1272, %v3033_v5  }
 0x2ad   :  { %1112 = vperm.xlu1 %1271, %v2955_v52  }
 0x2b0   :  { %1076 = vperm.xlu0 %1272, %v2958_v20  }
 0x2b1   :  { %1120 = vperm.xlu1 %1271, %v2957_v13  }
 0x2b4   :  { %1084 = vperm.xlu0 %1272, %v2960_v43  }
 0x2b5   :  { %1128 = vperm.xlu1 %1271, %v2959_v31  }
 0x2b8   :  { %1092 = vperm.xlu0 %1272, %v2962_v38  }
 0x2b9   :  { %1136 = vperm.xlu1 %1271, %v2961_v18  }
 0x2bc   :  { %1100 = vperm.xlu0 %1272, %v2963_v48  }
 0x2c0   :  { %1108 = vperm.xlu0 %1272, %v2964_v4  }
 0x2c4   :  { %1116 = vperm.xlu0 %1272, %v2965_v45  }
 0x2c8   :  { %1124 = vperm.xlu0 %1272, %v2966_v53  }
 0x2ca   :  { %v2472_v23 = vpop.permute.xlu1 %949 }
 0x2cc   :  { %1132 = vperm.xlu0 %1272, %v2967_v56  }
 0x2ce   :  { %v2475_v34 = vpop.permute.xlu1 %951 }
 0x2d2   :  { %v2477_v3 = vpop.permute.xlu1 %955 }
 0x2d6   :  { %v2479_v14 = vpop.permute.xlu1 %959 }
 0x2da   :  { %v2481_v25 = vpop.permute.xlu1 %963 }
 0x2db   :  { %3034 = vst [vmem:[#allocation42_spill] sm:$0xff] %v2481_v25 }
 0x2de   :  { %v2483_v35 = vpop.permute.xlu1 %967 }
 0x2df   :  { %3035 = vst [vmem:[#allocation38_spill] sm:$0xff] %v2483_v35 }
 0x2e2   :  { %v2487_v29 = vpop.permute.xlu1 %971 }
 0x2e3   :  { %3036 = vst [vmem:[#allocation47_spill] sm:$0xff] %v2487_v29 }
 0x2e6   :  { %v2485_v21 = vpop.permute.xlu0 %947 }
 0x2e7   :  { %v2493_v11 = vpop.permute.xlu1 %975 }
 0x2e8   :  { %3037 = vst [vmem:[#allocation40_spill] sm:$0xff] %v2493_v11 }
 0x2ea   :  { %v2489_v32 = vpop.permute.xlu0 %953 }
 0x2ee   :  { %v2491_v19 = vpop.permute.xlu0 %957 }
 0x2f2   :  { %v2495_v36 = vpop.permute.xlu0 %961 }
 0x2f3   :  { %3038 = vst [vmem:[#allocation39_spill] sm:$0xff] %v2495_v36 }
 0x2f4   :  { %v1013_v2 = vpop.permute.xlu1 %1012 }
 0x2f5   :  { %vm1059_vm0 = vcmp.eq.s32.totalorder %v2373_v8, %v1013_v2 }
 0x2f6   :  { %v2497_v37 = vpop.permute.xlu0 %965 }
 0x2f7   :  { %3039 = vst [vmem:[#allocation41_spill] sm:$0xff] %v2497_v37 }
 0x2f8   :  { %v1019_v63 = vpop.permute.xlu1 %1018 }
 0x2f9   :  { %vm1061_vm2 = vcmp.eq.s32.totalorder %v2373_v8, %v1019_v63 }
 0x2fa   :  { %v2499_v5 = vpop.permute.xlu0 %969 }
 0x2fb   :  { %3040 = vst [vmem:[#allocation43_spill] sm:$0xff] %v2499_v5  ;;  %v647_v5 = vsel %vm551_vm13, %v2349_v44, 0.0  ;;  %vm558_vm13 = vcmp.eq.s32.totalorder %v2373_v8, %v2355_v59 }
 0x2fc   :  { %v1022_v47 = vpop.permute.xlu1 %1021 }
 0x2fd   :  { %vm1062_vm7 = vcmp.eq.s32.totalorder %v2373_v8, %v1022_v47  ;;  %v1371_v47 = vld [vmem:[#allocation2 + $0x10] sm:$0xff] }
 0x2fe   :  { %v2503_v56 = vpop.permute.xlu0 %973 }
 0x2ff   :  { %3041 = vst [vmem:[#allocation13_spill] sm:$0xff] %v2503_v56 }
 0x300   :  { %v1028_v18 = vpop.permute.xlu1 %1027 }
 0x301   :  { %vm1064_vm12 = vcmp.eq.s32.totalorder %v2373_v8, %v1028_v18  ;;  %v1372_v18 = vld [vmem:[#allocation2 + $0x18] sm:$0xff] }
 0x302   :  { %v2507_v29 = vpop.permute.xlu0 %977 }
 0x303   :  { %3042 = vst [vmem:[#allocation32_spill] sm:$0xff] %v2507_v29 }
 0x304   :  { %v2501_v33 = vpop.permute.xlu1 %1033 }
 0x305   :  { %vm1066_vm5 = vcmp.eq.s32.totalorder %v2373_v8, %v2501_v33  ;;  %v653_v33 = vsel %vm557_vm11, %v2361_v55, 0.0  ;;  %v3044_v55 = vld [vmem:[#allocation61_spill] sm:$0xff] }
 0x308   :  { %v2505_v31 = vpop.permute.xlu1 %1039 }
 0x30c   :  { %v2509_v15 = vpop.permute.xlu1 %1045 }
 0x30f   :  { %v1016_v11 = vpop.permute.xlu0 %1015 }
 0x310   :  { %v2511_v9 = vpop.permute.xlu1 %1051  ;;  %vm1060_vm4 = vcmp.eq.s32.totalorder %v2373_v8, %v1016_v11 }
 0x313   :  { %v1025_v13 = vpop.permute.xlu0 %1024 }
 0x314   :  { %v2513_v53 = vpop.permute.xlu1 %1057  ;;  %vm1063_vm10 = vcmp.eq.s32.totalorder %v2373_v8, %v1025_v13 }
 0x315   :  { %vm1074_vm3 = vcmp.eq.s32.totalorder %v2373_v8, %v2513_v53  ;;  %v1383_v53 = vld [vmem:[#allocation2 + $0x70] sm:$0xff] }
 0x317   :  { %v2515_v37 = vpop.permute.xlu0 %1030 }
 0x318   :  { %v1081_v56 = vpop.permute.xlu1 %1080  ;;  %vm1065_vm8 = vcmp.eq.s32.totalorder %v2373_v8, %v2515_v37 }
 0x319   :  { %v1140_v35 = vsel %vm1060_vm4, %v1081_v56, 0.0  ;;  %vm1068_vm4 = vcmp.eq.s32.totalorder %v2373_v8, %v2505_v31  ;;  %v3045_v31 = vld [vmem:[#allocation66_spill] sm:$0xff] }
 0x31a   :  { %v1156_v29 = vadd.f32 %v1140_v35, %v647_v5 }
 0x31b   :  { %v2521_v45 = vpop.permute.xlu0 %1036 }
 0x31c   :  { %v1172_v52 = vmul.f32 %v1369_v12, %v1156_v29  ;;  %v1089_v25 = vpop.permute.xlu1 %1088  ;;  %vm1067_vm6 = vcmp.eq.s32.totalorder %v2373_v8, %v2521_v45  ;;  %v1376_v45 = vld [vmem:[#allocation2 + $0x38] sm:$0xff] }
 0x31d   :  { %v1142_v5 = vsel %vm1062_vm7, %v1089_v25, 0.0 }
 0x31e   :  { %1189 = vadd.xlane.f32.xlu1 %v1172_v52  ;;  %v1370_v52 = vld [vmem:[#allocation2] sm:$0xff] }
 0x31f   :  { %v2523_v36 = vpop.permute.xlu0 %1042 }
 0x320   :  { %v1097_v50 = vpop.permute.xlu1 %1096  ;;  %vm1069_vm7 = vcmp.eq.s32.totalorder %v2373_v8, %v2523_v36  ;;  %v3050_v36 = vld [vmem:[#allocation65_spill] sm:$0xff] }
 0x323   :  { %v2525_v4 = vpop.permute.xlu0 %1048 }
 0x324   :  { %v1105_v35 = vpop.permute.xlu1 %1104 }
 0x327   :  { %v2527_v41 = vpop.permute.xlu0 %1054 }
 0x328   :  { %v1113_v63 = vpop.permute.xlu1 %1112 }
 0x32b   :  { %v1077_v56 = vpop.permute.xlu0 %1076 }
 0x32c   :  { %v1139_v44 = vsel %vm1059_vm0, %v1077_v56, 0.0  ;;  %v649_v56 = vsel %vm553_vm9, %v2353_v10, 0.0  ;;  %v1121_v40 = vpop.permute.xlu1 %1120  ;;  %vm559_vm0 = vcmp.eq.s32.totalorder %v2373_v8, %v3044_v55  ;;  %v1381_v55 = vld [vmem:[#allocation2 + $0x60] sm:$0xff] }
 0x32d   :  { %v1155_v12 = vadd.f32 %v1139_v44, %v646_v0  ;;  %v1158_v60 = vadd.f32 %v1142_v5, %v649_v56  ;;  %v650_v0 = vsel %vm554_vm15, %v2380_v27, 0.0  ;;  %v1144_v44 = vsel %vm1064_vm12, %v1097_v50, 0.0  ;;  %v1373_v50 = vld [vmem:[#allocation2 + $0x20] sm:$0xff] }
 0x32e   :  { %v1160_v27 = vadd.f32 %v1144_v44, %v651_v1  ;;  %v1148_v56 = vsel %vm1068_vm4, %v1113_v63, 0.0  ;;  %v1377_v44 = vld [vmem:[#allocation2 + $0x40] sm:$0xff]  ;;  %v3047_v1 = vld [vmem:[#allocation71_spill] sm:$0xff]  ;;  %vm562_vm15 = vcmp.eq.s32.totalorder %v2373_v8, %v3050_v36  ;;  %vm1072_vm12 = vcmp.eq.s32.totalorder %v2373_v8, %v2511_v9  ;;  %v3053_v9 = vld [vmem:[#allocation68_spill] sm:$0xff] }
 0x32f   :  { %v1171_v29 = vmul.f32 %v1370_v52, %v1155_v12  ;;  %v1085_v11 = vpop.permute.xlu0 %1084  ;;  %v1174_v13 = vmul.f32 %v1372_v18, %v1158_v60 }
 0x330   :  { %v1141_v2 = vsel %vm1061_vm2, %v1085_v11, 0.0  ;;  %v1176_v37 = vmul.f32 %v1374_v28, %v1160_v27  ;;  %vm1070_vm2 = vcmp.eq.s32.totalorder %v2373_v8, %v2509_v15  ;;  %v3049_v15 = vld [vmem:[#allocation67_spill] sm:$0xff]  ;;  %v3051_v28 = vld [vmem:[#allocation72_spill] sm:$0xff] }
 0x331   :  { %v1157_v17 = vadd.f32 %v1141_v2, %v648_v51  ;;  %1187 = vadd.xlane.f32.xlu0 %v1171_v29  ;;  %v1146_v29 = vsel %vm1066_vm5, %v1105_v35, 0.0  ;;  %v1375_v51 = vld [vmem:[#allocation2 + $0x30] sm:$0xff]  ;;  %v3043_v2 = vld [vmem:[#allocation70_spill] sm:$0xff]  ;;  %vm1073_vm5 = vcmp.eq.s32.totalorder %v2373_v8, %v2527_v41  ;;  %v1384_v41 = vld [vmem:[#allocation2 + $0x78] sm:$0xff] }
 0x332   :  { %v1162_v35 = vadd.f32 %v1146_v29, %v653_v33 }
 0x333   :  { %v1173_v39 = vmul.f32 %v1371_v47, %v1157_v17  ;;  %v1093_v25 = vpop.permute.xlu0 %1092  ;;  %v654_v17 = vsel %vm558_vm13, %v3043_v2, 0.0  ;;  %v655_v47 = vsel %vm559_vm0, %v3045_v31, 0.0 }
 0x334   :  { %v1143_v30 = vsel %vm1063_vm10, %v1093_v25, 0.0  ;;  %v1178_v63 = vmul.f32 %v1376_v45, %v1162_v35  ;;  %v1164_v25 = vadd.f32 %v1148_v56, %v655_v47  ;;  %vm1071_vm10 = vcmp.eq.s32.totalorder %v2373_v8, %v2525_v4  ;;  %v1380_v4 = vld [vmem:[#allocation2 + $0x58] sm:$0xff] }
 0x335   :  { %v1159_v10 = vadd.f32 %v1143_v30, %v650_v0  ;;  %1191 = vadd.xlane.f32.xlu0 %v1173_v39  ;;  %v3046_v39 = vld [vmem:[#allocation64_spill] sm:$0xff]  ;;  %v1129_v0 = vpop.permute.xlu1 %1128  ;;  %v3054_v45 = vld [vmem:[#allocation73_spill] sm:$0xff] }
 0x336   :  { %vm560_vm1 = vcmp.eq.s32.totalorder %v2373_v8, %v3046_v39  ;;  %v1152_v35 = vsel %vm1072_vm12, %v1129_v0, 0.0 }
 0x337   :  { %v1175_v12 = vmul.f32 %v1373_v50, %v1159_v10  ;;  %v1101_v52 = vpop.permute.xlu0 %1100  ;;  %v656_v18 = vsel %vm560_vm1, %v3047_v1, 0.0  ;;  %v3048_v50 = vld [vmem:[#allocation62_spill] sm:$0xff] }
 0x338   :  { %v1145_v11 = vsel %vm1065_vm8, %v1101_v52, 0.0  ;;  %vm561_vm9 = vcmp.eq.s32.totalorder %v2373_v8, %v3048_v50  ;;  %v3056_v1 = vld [vmem:[#allocation22_spill] sm:$0xff]  ;;  %vm1235_vm8 = vcmask 7168  }
 0x339   :  { %v1161_v57 = vadd.f32 %v1145_v11, %v652_v49  ;;  %1193 = vadd.xlane.f32.xlu0 %v1174_v13  ;;  %1195 = vadd.xlane.f32.xlu1 %v1175_v12  ;;  %v1150_v13 = vsel %vm1070_vm2, %v1121_v40, 0.0  ;;  %v657_v52 = vsel %vm561_vm9, %v3049_v15, 0.0  ;;  %v1378_v49 = vld [vmem:[#allocation2 + $0x48] sm:$0xff]  ;;  %v1379_v40 = vld [vmem:[#allocation2 + $0x50] sm:$0xff] }
 0x33a   :  { %v1180_v29 = vmul.f32 %v1378_v49, %v1164_v25  ;;  %v1166_v11 = vadd.f32 %v1150_v13, %v657_v52  ;;  %v1382_v25 = vld [vmem:[#allocation2 + $0x68] sm:$0xff]  ;;  %v3058_v15 = vld [vmem:[#allocation16_spill] sm:$0xff] }
 0x33b   :  { %v1177_v46 = vmul.f32 %v1375_v51, %v1161_v57  ;;  %v1109_v5 = vpop.permute.xlu0 %1108  ;;  %v408_v52 = vmax.f32 %v3058_v15, 1e-30  ;;  %v3059_v49 = vld [vmem:[#allocation19_spill] sm:$0xff] }
 0x33c   :  { %v1147_v60 = vsel %vm1067_vm6, %v1109_v5, 0.0  ;;  %v1137_v5 = vpop.permute.xlu1 %1136  ;;  %v1182_v56 = vmul.f32 %v1380_v4, %v1166_v11  ;;  %v3060_v11 = vld [vmem:[#allocation12_spill] sm:$0xff] }
 0x33d   :  { %v1163_v59 = vadd.f32 %v1147_v60, %v654_v17  ;;  %1197 = vadd.xlane.f32.xlu0 %v1176_v37  ;;  %1199 = vadd.xlane.f32.xlu1 %v1177_v46  ;;  %v658_v37 = vsel %vm562_vm15, %v3051_v28, 0.0  ;;  %v3052_v46 = vld [vmem:[#allocation63_spill] sm:$0xff]  ;;  %v1154_v47 = vsel %vm1074_vm3, %v1137_v5, 0.0 }
 0x33e   :  { %vm563_vm14 = vcmp.eq.s32.totalorder %v2373_v8, %v3052_v46 }
 0x33f   :  { %v1179_v30 = vmul.f32 %v1377_v44, %v1163_v59  ;;  %v1117_v10 = vpop.permute.xlu0 %1116  ;;  %v659_v17 = vsel %vm563_vm14, %v3053_v9, 0.0  ;;  %v3055_v44 = vld [vmem:[#allocation69_spill] sm:$0xff] }
 0x340   :  { %v1149_v27 = vsel %vm1069_vm7, %v1117_v10, 0.0  ;;  %v1168_v60 = vadd.f32 %v1152_v35, %v659_v17 }
 0x341   :  { %v1165_v12 = vadd.f32 %v1149_v27, %v656_v18  ;;  %1201 = vadd.xlane.f32.xlu0 %v1178_v63  ;;  %1203 = vadd.xlane.f32.xlu1 %v1179_v30  ;;  %v1170_v30 = vadd.f32 %v1154_v47, %v3055_v44  ;;  %v407_v18 = vmax.f32 %v3056_v1, 1e-30  ;;  %v3057_v27 = vld [vmem:[#allocation14_spill] sm:$0xff]  ;;  %v3067_v47 = vld [vmem:[#allocation56_spill] sm:$0xff] }
 0x342   :  { %v1184_v0 = vmul.f32 %v1382_v25, %v1168_v60  ;;  %v406_v50 = vmax.f32 %v3057_v27, 1e-30 }
 0x343   :  { %v1181_v57 = vmul.f32 %v1379_v40, %v1165_v12  ;;  %v1125_v33 = vpop.permute.xlu0 %1124  ;;  %v1186_v8 = vmul.f32 %v1384_v41, %v1170_v30  ;;  %1337 = vlog2.f32 %v407_v18  ;;  %v410_v40 = vmax.f32 %v3060_v11, 1e-30  ;;  %v3069_v41 = vld [vmem:[#allocation58_spill] sm:$0xff] }
 0x344   :  { %v1151_v51 = vsel %vm1071_vm10, %v1125_v33, 0.0  ;;  %1339 = vlog2.f32 %v406_v50  ;;  %v3061_v33 = vld [vmem:[#allocation15_spill] sm:$0xff] }
 0x345   :  { %v1167_v2 = vadd.f32 %v1151_v51, %v658_v37  ;;  %1205 = vadd.xlane.f32.xlu0 %v1180_v29  ;;  %1207 = vadd.xlane.f32.xlu1 %v1181_v57  ;;  %1341 = vlog2.f32 %v408_v52  ;;  %v409_v29 = vmax.f32 %v3059_v49, 1e-30  ;;  %v411_v28 = vmax.f32 %v3061_v33, 1e-30  ;;  %v3062_v37 = vld [vmem:[#allocation18_spill] sm:$0xff] }
 0x346   :  { %v412_v35 = vmax.f32 %v3062_v37, 1e-30 }
 0x347   :  { %v1183_v59 = vmul.f32 %v1381_v55, %v1167_v2  ;;  %v1133_v31 = vpop.permute.xlu0 %1132  ;;  %1343 = vlog2.f32 %v409_v29  ;;  %v3066_v55 = vld [vmem:[#allocation55_spill] sm:$0xff]  ;;  %v3071_v29 = vld [vmem:[#allocation60_spill] sm:$0xff] }
 0x348   :  { %v1153_v39 = vsel %vm1073_vm5, %v1133_v31, 0.0  ;;  %1345 = vlog2.f32 %v410_v40  ;;  %v421_v11 = vmax.f32 %v3071_v29, 1e-30  ;;  %v3072_v40 = vld [vmem:[#allocation44_spill] sm:$0xff] }
 0x349   :  { %v1169_v63 = vadd.f32 %v1153_v39, %v3054_v45  ;;  %1209 = vadd.xlane.f32.xlu0 %v1182_v56  ;;  %1211 = vadd.xlane.f32.xlu1 %v1183_v59  ;;  %1347 = vlog2.f32 %v411_v28  ;;  %v3065_v56 = vld [vmem:[#allocation54_spill] sm:$0xff]  ;;  %v416_v59 = vmax.f32 %v3066_v55, 1e-30  ;;  %v417_v39 = vmax.f32 %v3067_v47, 1e-30  ;;  %v3068_v45 = vld [vmem:[#allocation57_spill] sm:$0xff] }
 0x34a   :  { %1349 = vlog2.f32 %v412_v35 }
 0x34b   :  { %v1185_v10 = vmul.f32 %v1383_v53, %v1169_v63  ;;  %v418_v63 = vmax.f32 %v3068_v45, 1e-30 }
 0x34d   :  { %1213 = vadd.xlane.f32.xlu0 %v1184_v0  ;;  %1215 = vadd.xlane.f32.xlu1 %v1185_v10 }
 0x350   :  { %v1338_v13 = vpop.eup %1337 }
 0x351   :  { %1217 = vadd.xlane.f32.xlu0 %v1186_v8  ;;  %v425_v12 = vmul.f32 0.6931472, %v1338_v13  ;;  %v1340_v17 = vpop.eup %1339  ;;  %v419_v8 = vmax.f32 %v3069_v41, 1e-30  ;;  %v3070_v13 = vld [vmem:[#allocation59_spill] sm:$0xff] }
 0x352   :  { %v1342_v4 = vpop.eup %1341  ;;  %v423_v60 = vmul.f32 0.6931472, %v1340_v17  ;;  %v420_v27 = vmax.f32 %v3070_v13, 1e-30  ;;  %v3079_v13 = vld [vmem:[#allocation51_spill] sm:$0xff] }
 0x353   :  { %v455_v36 = vadd.f32 %v425_v12, %v3015_v26  ;;  %v3063_v26 = vld [vmem:[#allocation21_spill] sm:$0xff]  ;;  %v427_v31 = vmul.f32 0.6931472, %v1342_v4 }
 0x354   :  { %v413_v2 = vmax.f32 %v3063_v26, 1e-30  ;;  %v1344_v25 = vpop.eup %1343  ;;  %v454_v0 = vadd.f32 %v423_v60, %v3018_v6 }
 0x355   :  { %v471_v57 = vmul.f32 %v455_v36, %v2947_v24  ;;  %v3064_v24 = vld [vmem:[#allocation53_spill] sm:$0xff]  ;;  %v1346_v44 = vpop.eup %1345  ;;  %v456_v30 = vadd.f32 %v427_v31, %v3016_v7  ;;  %v429_v10 = vmul.f32 0.6931472, %v1344_v25 }
 0x356   :  { %v414_v9 = vmax.f32 %v3064_v24, 1e-30  ;;  %1351 = vlog2.f32 %v413_v2  ;;  %v1348_v53 = vpop.eup %1347  ;;  %v431_v18 = vmul.f32 0.6931472, %v1346_v44  ;;  %v470_v50 = vmul.f32 %v454_v0, %v2958_v20  ;;  %v3074_v31 = vld [vmem:[#allocation45_spill] sm:$0xff] }
 0x357   :  { %v996_v51 = vadd.f32 %v2472_v23, %v471_v57  ;;  %v415_v23 = vmax.f32 %v3065_v56, 1e-30  ;;  %v1350_v1 = vpop.eup %1349  ;;  %v472_v12 = vmul.f32 %v456_v30, %v2960_v43  ;;  %v433_v6 = vmul.f32 0.6931472, %v1348_v53  ;;  %v3076_v25 = vld [vmem:[#allocation49_spill] sm:$0xff] }
 0x358   :  { %1353 = vlog2.f32 %v414_v9  ;;  %v995_v15 = vadd.f32 %v2485_v21, %v470_v50  ;;  %v435_v52 = vmul.f32 0.6931472, %v1350_v1  ;;  %v457_v7 = vadd.f32 %v429_v10, %v3019_v54  ;;  %v3077_v10 = vld [vmem:[#allocation42_spill] sm:$0xff] }
 0x359   :  { %1355 = vlog2.f32 %v415_v23  ;;  %v458_v57 = vadd.f32 %v431_v18, %v3072_v40  ;;  %v997_v20 = vadd.f32 %v2475_v34, %v472_v12  ;;  %v459_v37 = vadd.f32 %v433_v6, %v3020_v62  ;;  %v3080_v50 = vld [vmem:[#allocation26_spill] sm:$0xff] }
 0x35a   :  { %1357 = vlog2.f32 %v416_v59  ;;  %v460_v21 = vadd.f32 %v435_v52, %v1862_v42  ;;  %v473_v54 = vmul.f32 %v457_v7, %v2949_v61 }
 0x35b   :  { %1359 = vlog2.f32 %v417_v39  ;;  %v475_v9 = vmul.f32 %v459_v37, %v2951_v16  ;;  %v3086_v37 = vld [vmem:[#allocation29_spill] sm:$0xff] }
 0x35c   :  { %1361 = vlog2.f32 %v418_v63  ;;  %v998_v24 = vadd.f32 %v2489_v32, %v473_v54  ;;  %v476_v62 = vmul.f32 %v460_v21, %v2963_v48  ;;  %v3085_v21 = vld [vmem:[#allocation31_spill] sm:$0xff] }
 0x35d   :  { %1363 = vlog2.f32 %v419_v8  ;;  %v1000_v59 = vadd.f32 %v2491_v19, %v475_v9  ;;  %v3075_v19 = vld [vmem:[#allocation25_spill] sm:$0xff]  ;;  %v3078_v8 = vld [vmem:[#allocation39_spill] sm:$0xff] }
 0x35e   :  { %1365 = vlog2.f32 %v420_v27  ;;  %v1001_v55 = vadd.f32 %v2479_v14, %v476_v62  ;;  %v3089_v62 = vld [vmem:[#allocation47_spill] sm:$0xff] }
 0x35f   :  { %1367 = vlog2.f32 %v421_v11 }
 0x363   :  { %v1352_v49 = vpop.eup %1351 }
 0x364   :  { %v437_v43 = vmul.f32 0.6931472, %v1352_v49  ;;  %v3082_v49 = vld [vmem:[#allocation28_spill] sm:$0xff] }
 0x365   :  { %v1354_v28 = vpop.eup %1353 }
 0x366   :  { %v461_v17 = vadd.f32 %v437_v43, %v3021_v22  ;;  %v3073_v22 = vld [vmem:[#allocation23_spill] sm:$0xff] }
 0x3a7   :  { %v1190_v46 = vpop.xlane.xlu1 %1189 }
 0x3a8   :  { %v1220_v5 = vsub.f32 %v996_v51, %v1190_v46  ;;  %v1356_v51 = vpop.eup %1355  ;;  %v439_v46 = vmul.f32 0.6931472, %v1354_v28 }
 0x3a9   :  { %v1358_v34 = vpop.eup %1357  ;;  %v441_v61 = vmul.f32 0.6931472, %v1356_v51  ;;  %v3087_v51 = vld [vmem:[#allocation48_spill] sm:$0xff] }
 0x3aa   :  { %1237 = vst.msk [vmem:[%s2727_s4 + $0x8] sm:$0xff] %vm1235_vm8, %v1220_v5  ;;  %v474_v5 = vmul.f32 %v458_v57, %v2962_v38  ;;  %v1360_v42 = vpop.eup %1359  ;;  %v443_v23 = vmul.f32 0.6931472, %v1358_v34 }
 0x3ab   :  { %v1362_v56 = vpop.eup %1361  ;;  %v445_v48 = vmul.f32 0.6931472, %v1360_v42  ;;  %v463_v47 = vadd.f32 %v441_v61, %v3074_v31  ;;  %v3095_v31 = vld [vmem:[#allocation13_spill] sm:$0xff] }
 0x3ac   :  { %v999_v2 = vadd.f32 %v2477_v3, %v474_v5  ;;  %v462_v3 = vadd.f32 %v439_v46, %v3017_v58  ;;  %v447_v16 = vmul.f32 0.6931472, %v1362_v56  ;;  %v477_v58 = vmul.f32 %v461_v17, %v3073_v22  ;;  %v1364_v45 = vpop.eup %1363  ;;  %v3090_v17 = vld [vmem:[#allocation43_spill] sm:$0xff]  ;;  %v3094_v22 = vld [vmem:[#allocation40_spill] sm:$0xff] }
 0x3ad   :  { %v464_v0 = vadd.f32 %v443_v23, %v3076_v25  ;;  %v1366_v53 = vpop.eup %1365  ;;  %v449_v18 = vmul.f32 0.6931472, %v1364_v45  ;;  %v479_v12 = vmul.f32 %v463_v47, %v3080_v50  ;;  %v3096_v45 = vld [vmem:[#allocation37_spill] sm:$0xff] }
 0x3ae   :  { %v478_v63 = vmul.f32 %v462_v3, %v3075_v19  ;;  %v1002_v1 = vadd.f32 %v3078_v8, %v477_v58  ;;  %v466_v27 = vadd.f32 %v447_v16, %v3079_v13  ;;  %v1368_v57 = vpop.eup %1367 }
 0x3af   :  { %v480_v29 = vmul.f32 %v464_v0, %v3082_v49  ;;  %v467_v46 = vadd.f32 %v449_v18, %v3087_v51  ;;  %v453_v34 = vmul.f32 0.6931472, %v1368_v57  ;;  %v3097_v0 = vld [vmem:[#allocation32_spill] sm:$0xff] }
 0x3b0   :  { %v1003_v41 = vadd.f32 %v3077_v10, %v478_v63  ;;  %v482_v54 = vmul.f32 %v466_v27, %v3085_v21 }
 0x3b2   :  { %v1007_v9 = vadd.f32 %v3089_v62, %v482_v54 }
 0x3ba   :  { %v1188_v36 = vpop.xlane.xlu0 %1187 }
 0x3bb   :  { %v1219_v33 = vsub.f32 %v995_v15, %v1188_v36  ;;  %v3081_v15 = vld [vmem:[#allocation46_spill] sm:$0xff]  ;;  %v451_v36 = vmul.f32 0.6931472, %v1366_v53 }
 0x3bc   :  { %v465_v6 = vadd.f32 %v445_v48, %v3081_v15 }
 0x3bd   :  { %1236 = vst.msk [vmem:[%s2727_s4] sm:$0xff] %vm1235_vm8, %v1219_v33  ;;  %v3083_v33 = vld [vmem:[#allocation38_spill] sm:$0xff] }
 0x3be   :  { %v1192_v35 = vpop.xlane.xlu0 %1191  ;;  %v1005_v28 = vadd.f32 %v3083_v33, %v480_v29 }
 0x3bf   :  { %v1221_v26 = vsub.f32 %v997_v20, %v1192_v35  ;;  %v3084_v20 = vld [vmem:[#allocation41_spill] sm:$0xff]  ;;  %v481_v35 = vmul.f32 %v465_v6, %v3086_v37 }
 0x3c0   :  { %v1004_v43 = vadd.f32 %v3084_v20, %v479_v12 }
 0x3c1   :  { %1238 = vst.msk [vmem:[%s2727_s4 + $0x10] sm:$0xff] %vm1235_vm8, %v1221_v26 }
 0x3c2   :  { %v1196_v38 = vpop.xlane.xlu1 %1195  ;;  %v1194_v4 = vpop.xlane.xlu0 %1193 }
 0x3c3   :  { %v1223_v32 = vsub.f32 %v999_v2, %v1196_v38  ;;  %v1222_v60 = vsub.f32 %v998_v24, %v1194_v4  ;;  %v3088_v2 = vld [vmem:[#allocation52_spill] sm:$0xff]  ;;  %v1006_v38 = vadd.f32 %v3090_v17, %v481_v35  ;;  %v3091_v4 = vld [vmem:[#allocation33_spill] sm:$0xff] }
 0x3c4   :  { %v468_v24 = vadd.f32 %v451_v36, %v3088_v2  ;;  %v483_v56 = vmul.f32 %v467_v46, %v3091_v4 }
 0x3c5   :  { %1240 = vst.msk [vmem:[%s2727_s4 + $0x20] sm:$0xff] %vm1235_vm8, %v1223_v32  ;;  %1239 = vst.msk [vmem:[%s2727_s4 + $0x18] sm:$0xff] %vm1235_vm8, %v1222_v60  ;;  %v3092_v32 = vld [vmem:[#allocation35_spill] sm:$0xff] }
 0x3c6   :  { %v1200_v39 = vpop.xlane.xlu1 %1199  ;;  %v1198_v14 = vpop.xlane.xlu0 %1197  ;;  %v484_v60 = vmul.f32 %v468_v24, %v3092_v32  ;;  %v1008_v47 = vadd.f32 %v3095_v31, %v483_v56 }
 0x3c7   :  { %v1225_v44 = vsub.f32 %v1001_v55, %v1200_v39  ;;  %v1224_v30 = vsub.f32 %v1000_v59, %v1198_v14  ;;  %v3093_v55 = vld [vmem:[#allocation50_spill] sm:$0xff] }
 0x3c8   :  { %v469_v59 = vadd.f32 %v453_v34, %v3093_v55  ;;  %v1009_v58 = vadd.f32 %v3094_v22, %v484_v60 }
 0x3c9   :  { %1242 = vst.msk [vmem:[%s2727_s4 + $0x30] sm:$0xff] %vm1235_vm8, %v1225_v44  ;;  %1241 = vst.msk [vmem:[%s2727_s4 + $0x28] sm:$0xff] %vm1235_vm8, %v1224_v30 }
 0x3ca   :  { %v1204_v52 = vpop.xlane.xlu1 %1203  ;;  %v1202_v7 = vpop.xlane.xlu0 %1201  ;;  %v485_v19 = vmul.f32 %v469_v59, %v3096_v45 }
 0x3cb   :  { %v1227_v11 = vsub.f32 %v1003_v41, %v1204_v52  ;;  %v1226_v40 = vsub.f32 %v1002_v1, %v1202_v7 }
 0x3cc   :  { %v1010_v44 = vadd.f32 %v3097_v0, %v485_v19 }
 0x3cd   :  { %1244 = vst.msk [vmem:[%s2727_s4 + $0x40] sm:$0xff] %vm1235_vm8, %v1227_v11  ;;  %1243 = vst.msk [vmem:[%s2727_s4 + $0x38] sm:$0xff] %vm1235_vm8, %v1226_v40 }
 0x3ce   :  { %v1208_v5 = vpop.xlane.xlu1 %1207  ;;  %v1206_v26 = vpop.xlane.xlu0 %1205 }
 0x3cf   :  { %v1229_v42 = vsub.f32 %v1005_v28, %v1208_v5  ;;  %v1228_v61 = vsub.f32 %v1004_v43, %v1206_v26 }
 0x3d1   :  { %1246 = vst.msk [vmem:[%s2727_s4 + $0x50] sm:$0xff] %vm1235_vm8, %v1229_v42  ;;  %1245 = vst.msk [vmem:[%s2727_s4 + $0x48] sm:$0xff] %vm1235_vm8, %v1228_v61 }
 0x3d2   :  { %v1212_v23 = vpop.xlane.xlu1 %1211  ;;  %v1210_v3 = vpop.xlane.xlu0 %1209 }
 0x3d3   :  { %v1231_v48 = vsub.f32 %v1007_v9, %v1212_v23  ;;  %v1230_v16 = vsub.f32 %v1006_v38, %v1210_v3 }
 0x3d5   :  { %1248 = vst.msk [vmem:[%s2727_s4 + $0x60] sm:$0xff] %vm1235_vm8, %v1231_v48  ;;  %1247 = vst.msk [vmem:[%s2727_s4 + $0x58] sm:$0xff] %vm1235_vm8, %v1230_v16 }
 0x3d6   :  { %v1216_v39 = vpop.xlane.xlu1 %1215  ;;  %v1214_v14 = vpop.xlane.xlu0 %1213 }
 0x3d7   :  { %v1233_v63 = vsub.f32 %v1009_v58, %v1216_v39  ;;  %v1232_v25 = vsub.f32 %v1008_v47, %v1214_v14 }
 0x3d9   :  { %1250 = vst.msk [vmem:[%s2727_s4 + $0x70] sm:$0xff] %vm1235_vm8, %v1233_v63  ;;  %1249 = vst.msk [vmem:[%s2727_s4 + $0x68] sm:$0xff] %vm1235_vm8, %v1232_v25 }
 0x3da   :  { %v1218_v30 = vpop.xlane.xlu0 %1217 }
 0x3db   :  { %v1234_v53 = vsub.f32 %v1010_v44, %v1218_v30 }
 0x3dd   :  { %1251 = vst.msk [vmem:[%s2727_s4 + $0x78] sm:$0xff] %vm1235_vm8, %v1234_v53 }
 0x3de   :  { %1256 = vsyncpa [#allocation3], 1 }
 0x3df   :  { %1257 = vsyncpa [#allocation5], 1 }
 0x3e0   :  { %1258 = vsyncpa [#allocation8], 1 }

</bundles_post_ra>
